<compile_context>
chip_gen: v7x
topology: tpu7x:2x2x1
jax: 0.10.0
libtpu: 0.0.40
codegen_flags: <defaults>
</compile_context>

<pallas_src>
import numpy as np

import jax
import jax.numpy as jnp
from jax.experimental import pallas as pl
from jax.experimental.pallas import tpu as pltpu


# --------------------- parameter packing (host / init time) ------------------

def _round_up(x, m):
    return ((x + m - 1) // m) * m


def _conv_as_matrix(w, H, W, stride, pad):
    """Pack Conv2d weights (Cout, Cin, KH, KW) into a dense matrix M of shape
    (Cin*H*W, Cout*OH*OW) such that  y_flat = x_flat @ M  reproduces the conv
    (x_flat/y_flat are NCHW tensors flattened per batch element)."""
    Cout, Cin, KH, KW = w.shape
    OH = (H + 2 * pad - KH) // stride + 1
    OW = (W + 2 * pad - KW) // stride + 1
    S = np.zeros((KH, KW, H * W, OH * OW), np.float32)
    for oh in range(OH):
        for ow in range(OW):
            for kh in range(KH):
                for kw in range(KW):
                    ih = stride * oh + kh - pad
                    iw = stride * ow + kw - pad
                    if 0 <= ih < H and 0 <= iw < W:
                        S[kh, kw, ih * W + iw, oh * OW + ow] = 1.0
    # M4[c, p, o, s] = sum_{kh,kw} w[o, c, kh, kw] * S[kh, kw, p, s]
    M4 = jnp.einsum('ocij,ijps->cpos', w.astype(jnp.float32), jnp.asarray(S))
    return M4.reshape(Cin * H * W, Cout * OH * OW)


def init_params(key, nc, ndf, isize):
    """Weights in PyTorch layout for DCGAN_D(isize=16, nc, ndf)."""
    assert isize == 16
    k1, k2, k3, k4, k5 = jax.random.split(key, 5)
    w1 = 0.02 * jax.random.normal(k1, (ndf, nc, 4, 4), jnp.float32)
    w2 = 0.02 * jax.random.normal(k2, (2 * ndf, ndf, 4, 4), jnp.float32)
    gamma = 1.0 + 0.02 * jax.random.normal(k3, (2 * ndf,), jnp.float32)
    beta = 0.02 * jax.random.normal(k4, (2 * ndf,), jnp.float32)
    w3 = 0.02 * jax.random.normal(k5, (1, 2 * ndf, 4, 4), jnp.float32)
    return (w1, w2, gamma, beta, w3)


def prepare_params(params, isize, nc_img, n_classes):
    """One-time pre-packing of weights into the fused-kernel operand layout.

    Returns lane-dense, zero-padded, bf16 (matmul) / f32 (epilogue) operands:
      m1     (K1p, N1p) bf16 : layer-1 conv matrix with label rows folded+stacked
      m2     (N1p, N2p) bf16 : layer-2 conv matrix
      w3col  (N2p, 1)   f32  : final 4x4 valid conv as a column vector
      e_mat  (N2p, C3p) f32  : column -> channel 0/(1/S3) indicator (pre-scaled)
      et_mat (C3p, N2p) f32  : channel -> column 0/1 indicator
      gamma, beta (1, C3p) f32
    """
    assert isize == 16
    w1, w2, gamma, beta, w3 = params
    HW1 = isize * isize

    # Layer 1: dense conv matrix; spatially-constant label channels collapse to
    # n_classes extra rows (folded spatial sum) stacked under the image rows.
    M1 = _conv_as_matrix(w1, isize, isize, stride=2, pad=1)     # (nc*HW1, ndf*64)
    M1a = M1[: nc_img * HW1, :]
    M1b = M1[nc_img * HW1:, :].reshape(n_classes, HW1, -1).sum(axis=1)
    M1f = jnp.concatenate([M1a, M1b], axis=0)                   # (K1, N1)
    K1, N1 = M1f.shape

    H2 = isize // 2
    M2 = _conv_as_matrix(w2, H2, H2, stride=2, pad=1)           # (N1, N2)
    N2 = M2.shape[1]
    C3 = w2.shape[0]                     # 2*ndf channels entering the final conv
    S3 = (isize // 4) ** 2               # 4*4 spatial positions per channel

    # Lane/sublane-dense padding (zeros are exact no-ops through every layer).
    K1p = _round_up(K1, 128)
    N1p = _round_up(N1, 128)
    N2p = _round_up(N2, 128)
    C3p = _round_up(C3, 128)

    def pad2(x, r, c):
        return jnp.pad(x, ((0, r - x.shape[0]), (0, c - x.shape[1])))

    m1 = pad2(M1f, K1p, N1p).astype(jnp.bfloat16)
    m2 = pad2(M2, N1p, N2p).astype(jnp.bfloat16)
    w3col = pad2(w3.reshape(C3 * S3, 1).astype(jnp.float32), N2p, 1)

    # 0/1 indicators: column s of the layer-2 slab belongs to channel s // S3.
    # e_mat is pre-scaled by 1/S3 so per-channel means need only a 1/B factor.
    E = np.zeros((N2, C3), np.float32)
    E[np.arange(N2), np.arange(N2) // S3] = 1.0 / S3
    Et = np.zeros((C3, N2), np.float32)
    Et[np.arange(N2) // S3, np.arange(N2)] = 1.0
    e_mat = pad2(jnp.asarray(E), N2p, C3p)
    et_mat = pad2(jnp.asarray(Et), C3p, N2p)

    g_mat = pad2(gamma.reshape(1, C3).astype(jnp.float32), 1, C3p)
    b_mat = pad2(beta.reshape(1, C3).astype(jnp.float32), 1, C3p)

    return (m1, m2, w3col, e_mat, et_mat, g_mat, b_mat)


# ------------------------------- Pallas kernel --------------------------------

def _dcgan_d_kernel(x_ref, m1_ref, m2_ref, w3_ref, e_ref, et_ref,
                    gamma_ref, beta_ref, out_ref):
    f32 = jnp.float32
    bf16 = jnp.bfloat16

    x = x_ref[...]                                               # (B, K1p) bf16
    B = x.shape[0]
    inv_b = 1.0 / B

    # ---- layer 1: Conv2d(nc, ndf, 4, 2, 1) (+ folded label) + LeakyReLU(0.2) -
    y1 = jnp.dot(x, m1_ref[...], preferred_element_type=f32)     # (B, N1p) f32
    y1 = jnp.maximum(y1, 0.2 * y1)

    # ---- layer 2: Conv2d(ndf, 2ndf, 4, 2, 1) ---------------------------------
    y2 = jnp.dot(y1.astype(bf16), m2_ref[...],
                 preferred_element_type=f32)                     # (B, N2p) f32

    # ---- training-mode BatchNorm statistics, all reductions on the MXU -------
    ones_b = jnp.ones((1, B), f32)
    col_sum = jnp.dot(ones_b, y2, preferred_element_type=f32)    # (1, N2p)
    col_sq = jnp.dot(ones_b, y2 * y2, preferred_element_type=f32)  # (1, N2p)
    mean = jnp.dot(col_sum, e_ref[...], preferred_element_type=f32) * inv_b  # (1,C3p)
    msq = jnp.dot(col_sq, e_ref[...], preferred_element_type=f32) * inv_b    # (1,C3p)
    var = jnp.maximum(msq - mean * mean, 0.0)                    # biased, clamped
    inv = jax.lax.rsqrt(var + 1e-5)
    scale = gamma_ref[...] * inv                                 # (1, C3p)
    shift = beta_ref[...] - mean * scale                         # (1, C3p)
    scale_cols = jnp.dot(scale, et_ref[...], preferred_element_type=f32)  # (1,N2p)
    shift_cols = jnp.dot(shift, et_ref[...], preferred_element_type=f32)  # (1,N2p)

    y2 = y2 * scale_cols + shift_cols                            # BN apply (f32 VPU)
    y2 = jnp.maximum(y2, 0.2 * y2)                               # LeakyReLU(0.2)

    # ---- layer 3: Conv2d(2ndf, 1, 4, 1, 0) -> mean over batch (two thin matmuls)
    ymean = jnp.dot(ones_b * inv_b, y2, preferred_element_type=f32)    # (1, N2p)
    out_ref[...] = jnp.dot(ymean, w3_ref[...], preferred_element_type=f32)  # (1, 1)


def dcgan_d_forward(image, label, prepared):
    """image: (B, nc_img, isize, isize) NCHW; label: (B, n_classes) -> (1,)."""
    m1, m2, w3col, e_mat, et_mat, gamma, beta = prepared
    B = image.shape[0]

    # Flatten NCHW image, append the one-hot label (folded label rows in m1),
    # zero-pad K to the packed/padded contraction size, cast once to bf16.
    x = jnp.concatenate([image.reshape(B, -1).astype(jnp.float32),
                         label.astype(jnp.float32)], axis=1)
    k1p = m1.shape[0]
    pad_cols = k1p - x.shape[1]
    if pad_cols:
        x = jnp.pad(x, ((0, 0), (0, pad_cols)))
    x = x.astype(jnp.bfloat16)

    n1p, n2p = m2.shape
    flops = 2 * B * (k1p * n1p + n1p * n2p) + 8 * B * n2p
    bytes_accessed = ((m1.size + m2.size + x.size) * 2
                      + (w3col.size + e_mat.size + et_mat.size
                         + gamma.size + beta.size) * 4 + 4)

    vmem = pl.BlockSpec(memory_space=pltpu.MemorySpace.VMEM)
    out = pl.pallas_call(
        _dcgan_d_kernel,
        out_shape=jax.ShapeDtypeStruct((1, 1), jnp.float32),
        in_specs=[vmem] * 8,
        out_specs=vmem,
        compiler_params=pltpu.CompilerParams(
            vmem_limit_bytes=32 * 1024 * 1024),
        cost_estimate=pl.CostEstimate(flops=flops, transcendentals=0,
                                      bytes_accessed=bytes_accessed),
    )(x, m1, m2, w3col, e_mat, et_mat, gamma, beta)
    return out.reshape(1)


# ----------------------------- pure-JAX reference -----------------------------

def reference_forward(image, label, params, isize):
    w1, w2, gamma, beta, w3 = params
    B = image.shape[0]
    lab = jnp.broadcast_to(label[:, :, None, None],
                           (B, label.shape[1], isize, isize))
    x = jnp.concatenate([image, lab], axis=1)
    dn = ('NCHW', 'OIHW', 'NCHW')
    hp = jax.lax.Precision.HIGHEST
    y = jax.lax.conv_general_dilated(x, w1, (2, 2), [(1, 1), (1, 1)],
                                     dimension_numbers=dn, precision=hp)
    y = jnp.where(y > 0, y, 0.2 * y)
    y = jax.lax.conv_general_dilated(y, w2, (2, 2), [(1, 1), (1, 1)],
                                     dimension_numbers=dn, precision=hp)
    mean = jnp.mean(y, axis=(0, 2, 3), keepdims=True)
    var = jnp.var(y, axis=(0, 2, 3), keepdims=True)
    y = (y - mean) * jax.lax.rsqrt(var + 1e-5)
    y = y * gamma[None, :, None, None] + beta[None, :, None, None]
    y = jnp.where(y > 0, y, 0.2 * y)
    y = jax.lax.conv_general_dilated(y, w3, (1, 1), [(0, 0), (0, 0)],
                                     dimension_numbers=dn, precision=hp)
    return jnp.mean(y, axis=0).reshape(1)


if __name__ == "__main__":
    key = jax.random.PRNGKey(0)
    B, isize = 8, 16
    nc_img, n_classes, ndf = 3, 2, 8
    nc = nc_img + n_classes            # total channels into the first conv

    k_img, k_lab, k_par = jax.random.split(key, 3)
    image = jax.random.normal(k_img, (B, nc_img, isize, isize), jnp.float32)
    label_idx = jax.random.randint(k_lab, (B,), 0, n_classes)
    label = jax.nn.one_hot(label_idx, n_classes, dtype=jnp.float32)

    params = init_params(k_par, nc, ndf, isize)
    prepared = prepare_params(params, isize, nc_img, n_classes)   # once, at init

    fwd = jax.jit(dcgan_d_forward)
    out = fwd(image, label, prepared)
    jax.block_until_ready(out)
    assert out.shape == (1,), out.shape

    # Sanity check against a pure-JAX reference of the PyTorch module
    # (tolerance sized for the intentional bf16 weight/activation path).
    ref = reference_forward(image, label, params, isize)
    np.testing.assert_allclose(np.asarray(out), np.asarray(ref),
                               atol=5e-2, rtol=5e-2)

    print("KERNEL_OK")
</pallas_src>

<mosaic_0001>
module attributes {stable_mosaic.version = 11 : i64} {
  func.func @_dcgan_d_kernel(%arg0: memref<8x896xbf16, #tpu.memory_space<vmem>>, %arg1: memref<896x512xbf16, #tpu.memory_space<vmem>>, %arg2: memref<512x256xbf16, #tpu.memory_space<vmem>>, %arg3: memref<256x1xf32, #tpu.memory_space<vmem>>, %arg4: memref<256x128xf32, #tpu.memory_space<vmem>>, %arg5: memref<128x256xf32, #tpu.memory_space<vmem>>, %arg6: memref<1x128xf32, #tpu.memory_space<vmem>>, %arg7: memref<1x128xf32, #tpu.memory_space<vmem>>, %arg8: memref<1x1xf32, #tpu.memory_space<vmem>>) attributes {dimension_semantics = [], scalar_prefetch = 0 : i64, scratch_operands = 0 : i64, tpu.core_type = #tpu.core_type<tc>} {
    %c0 = arith.constant 0 : index
    %c0_0 = arith.constant 0 : index
    %0 = vector.load %arg0[%c0, %c0_0] : memref<8x896xbf16, #tpu.memory_space<vmem>>, vector<8x896xbf16>
    %c0_1 = arith.constant 0 : index
    %c0_2 = arith.constant 0 : index
    %1 = vector.load %arg1[%c0_1, %c0_2] : memref<896x512xbf16, #tpu.memory_space<vmem>>, vector<896x512xbf16>
    %cst = arith.constant dense<0.000000e+00> : vector<8x512xf32>
    %2 = tpu.matmul %0, %1, %cst {dimension_numbers = #tpu.dot_dimension_numbers<[1], [0], [0], [1], [0, 0, 1, 1], [], []>} : vector<8x896xbf16>, vector<896x512xbf16>, vector<8x512xf32> -> vector<8x512xf32>
    %cst_3 = arith.constant 2.000000e-01 : f32
    %3 = vector.broadcast %cst_3 : f32 to vector<8x512xf32>
    %4 = arith.mulf %3, %2 : vector<8x512xf32>
    %5 = arith.maximumf %2, %4 : vector<8x512xf32>
    %6 = arith.truncf %5 : vector<8x512xf32> to vector<8x512xbf16>
    %c0_4 = arith.constant 0 : index
    %c0_5 = arith.constant 0 : index
    %7 = vector.load %arg2[%c0_4, %c0_5] : memref<512x256xbf16, #tpu.memory_space<vmem>>, vector<512x256xbf16>
    %cst_6 = arith.constant dense<0.000000e+00> : vector<8x256xf32>
    %8 = tpu.matmul %6, %7, %cst_6 {dimension_numbers = #tpu.dot_dimension_numbers<[1], [0], [0], [1], [0, 0, 1, 1], [], []>} : vector<8x512xbf16>, vector<512x256xbf16>, vector<8x256xf32> -> vector<8x256xf32>
    %cst_7 = arith.constant 1.000000e+00 : f32
    %9 = vector.broadcast %cst_7 : f32 to vector<1x8xf32>
    %cst_8 = arith.constant dense<0.000000e+00> : vector<1x256xf32>
    %10 = tpu.matmul %9, %8, %cst_8 {dimension_numbers = #tpu.dot_dimension_numbers<[1], [0], [0], [1], [0, 0, 1, 1], [], []>} : vector<1x8xf32>, vector<8x256xf32>, vector<1x256xf32> -> vector<1x256xf32>
    %11 = arith.mulf %8, %8 : vector<8x256xf32>
    %cst_9 = arith.constant dense<0.000000e+00> : vector<1x256xf32>
    %12 = tpu.matmul %9, %11, %cst_9 {dimension_numbers = #tpu.dot_dimension_numbers<[1], [0], [0], [1], [0, 0, 1, 1], [], []>} : vector<1x8xf32>, vector<8x256xf32>, vector<1x256xf32> -> vector<1x256xf32>
    %c0_10 = arith.constant 0 : index
    %c0_11 = arith.constant 0 : index
    %13 = vector.load %arg4[%c0_10, %c0_11] : memref<256x128xf32, #tpu.memory_space<vmem>>, vector<256x128xf32>
    %cst_12 = arith.constant dense<0.000000e+00> : vector<1x128xf32>
    %14 = tpu.matmul %10, %13, %cst_12 {dimension_numbers = #tpu.dot_dimension_numbers<[1], [0], [0], [1], [0, 0, 1, 1], [], []>} : vector<1x256xf32>, vector<256x128xf32>, vector<1x128xf32> -> vector<1x128xf32>
    %cst_13 = arith.constant 1.250000e-01 : f32
    %15 = vector.broadcast %cst_13 : f32 to vector<1x128xf32>
    %16 = arith.mulf %14, %15 : vector<1x128xf32>
    %c0_14 = arith.constant 0 : index
    %c0_15 = arith.constant 0 : index
    %17 = vector.load %arg4[%c0_14, %c0_15] : memref<256x128xf32, #tpu.memory_space<vmem>>, vector<256x128xf32>
    %cst_16 = arith.constant dense<0.000000e+00> : vector<1x128xf32>
    %18 = tpu.matmul %12, %17, %cst_16 {dimension_numbers = #tpu.dot_dimension_numbers<[1], [0], [0], [1], [0, 0, 1, 1], [], []>} : vector<1x256xf32>, vector<256x128xf32>, vector<1x128xf32> -> vector<1x128xf32>
    %cst_17 = arith.constant 1.250000e-01 : f32
    %19 = vector.broadcast %cst_17 : f32 to vector<1x128xf32>
    %20 = arith.mulf %18, %19 : vector<1x128xf32>
    %21 = arith.mulf %16, %16 : vector<1x128xf32>
    %22 = arith.subf %20, %21 : vector<1x128xf32>
    %cst_18 = arith.constant 0.000000e+00 : f32
    %23 = vector.broadcast %cst_18 : f32 to vector<1x128xf32>
    %24 = arith.maximumf %22, %23 : vector<1x128xf32>
    %cst_19 = arith.constant 9.99999974E-6 : f32
    %25 = vector.broadcast %cst_19 : f32 to vector<1x128xf32>
    %26 = arith.addf %24, %25 : vector<1x128xf32>
    %27 = math.rsqrt %26 : vector<1x128xf32>
    %c0_20 = arith.constant 0 : index
    %c0_21 = arith.constant 0 : index
    %28 = vector.load %arg6[%c0_20, %c0_21] : memref<1x128xf32, #tpu.memory_space<vmem>>, vector<1x128xf32>
    %29 = arith.mulf %28, %27 : vector<1x128xf32>
    %c0_22 = arith.constant 0 : index
    %c0_23 = arith.constant 0 : index
    %30 = vector.load %arg7[%c0_22, %c0_23] : memref<1x128xf32, #tpu.memory_space<vmem>>, vector<1x128xf32>
    %31 = arith.mulf %16, %29 : vector<1x128xf32>
    %32 = arith.subf %30, %31 : vector<1x128xf32>
    %c0_24 = arith.constant 0 : index
    %c0_25 = arith.constant 0 : index
    %33 = vector.load %arg5[%c0_24, %c0_25] : memref<128x256xf32, #tpu.memory_space<vmem>>, vector<128x256xf32>
    %cst_26 = arith.constant dense<0.000000e+00> : vector<1x256xf32>
    %34 = tpu.matmul %29, %33, %cst_26 {dimension_numbers = #tpu.dot_dimension_numbers<[1], [0], [0], [1], [0, 0, 1, 1], [], []>} : vector<1x128xf32>, vector<128x256xf32>, vector<1x256xf32> -> vector<1x256xf32>
    %c0_27 = arith.constant 0 : index
    %c0_28 = arith.constant 0 : index
    %35 = vector.load %arg5[%c0_27, %c0_28] : memref<128x256xf32, #tpu.memory_space<vmem>>, vector<128x256xf32>
    %cst_29 = arith.constant dense<0.000000e+00> : vector<1x256xf32>
    %36 = tpu.matmul %32, %35, %cst_29 {dimension_numbers = #tpu.dot_dimension_numbers<[1], [0], [0], [1], [0, 0, 1, 1], [], []>} : vector<1x128xf32>, vector<128x256xf32>, vector<1x256xf32> -> vector<1x256xf32>
    %37 = vector.broadcast %34 : vector<1x256xf32> to vector<8x256xf32>
    %38 = arith.mulf %8, %37 : vector<8x256xf32>
    %39 = vector.broadcast %36 : vector<1x256xf32> to vector<8x256xf32>
    %40 = arith.addf %38, %39 : vector<8x256xf32>
    %cst_30 = arith.constant 2.000000e-01 : f32
    %41 = vector.broadcast %cst_30 : f32 to vector<8x256xf32>
    %42 = arith.mulf %41, %40 : vector<8x256xf32>
    %43 = arith.maximumf %40, %42 : vector<8x256xf32>
    %cst_31 = arith.constant 1.250000e-01 : f32
    %44 = vector.broadcast %cst_31 : f32 to vector<1x8xf32>
    %45 = arith.mulf %9, %44 : vector<1x8xf32>
    %cst_32 = arith.constant dense<0.000000e+00> : vector<1x256xf32>
    %46 = tpu.matmul %45, %43, %cst_32 {dimension_numbers = #tpu.dot_dimension_numbers<[1], [0], [0], [1], [0, 0, 1, 1], [], []>} : vector<1x8xf32>, vector<8x256xf32>, vector<1x256xf32> -> vector<1x256xf32>
    %c0_33 = arith.constant 0 : index
    %c0_34 = arith.constant 0 : index
    %47 = vector.load %arg3[%c0_33, %c0_34] : memref<256x1xf32, #tpu.memory_space<vmem>>, vector<256x1xf32>
    %cst_35 = arith.constant dense<0.000000e+00> : vector<1x1xf32>
    %48 = tpu.matmul %46, %47, %cst_35 {dimension_numbers = #tpu.dot_dimension_numbers<[1], [0], [0], [1], [0, 0, 1, 1], [], []>} : vector<1x256xf32>, vector<256x1xf32>, vector<1x1xf32> -> vector<1x1xf32>
    %c0_36 = arith.constant 0 : index
    %c0_37 = arith.constant 0 : index
    %49 = vector.load %arg8[%c0_36, %c0_37] : memref<1x1xf32, #tpu.memory_space<vmem>>, vector<1x1xf32>
    tpu.vector_store %arg8[%c0_36, %c0_37], %48 {strides = array<i32>} : memref<1x1xf32, #tpu.memory_space<vmem>>, vector<1x1xf32>,
    return
  }
}

</mosaic_0001>

<bundles_post_ra>
// kernel: dcgan_d_forward.1
= control target key start
LH: loop header
LB: loop body
LE: loop exit
PB: predicated region body
PF: predicated region fallthrough
CT: control target
= control target key end

     0   :  { %13 = vsyncpa [#allocation3], 0  ;;  %s4670_s0 = inlined_call_operand.vmem [shape: bf16[8,896], index: 0, kind: input, shape index: {}]   ;;  %s4671_s1 = inlined_call_operand.hbm [shape: bf16[896,512], index: 1, kind: input, shape index: {}]   ;;  %s4672_s2 = inlined_call_operand.vmem [shape: bf16[512,256], index: 2, kind: input, shape index: {}]   ;;  %s4673_s3 = inlined_call_operand.vmem [shape: f32[256,1], index: 3, kind: input, shape index: {}]   ;;  %s4674_s4 = inlined_call_operand.vmem [shape: f32[256,128], index: 4, kind: input, shape index: {}]   ;;  %s4675_s5 = inlined_call_operand.vmem [shape: f32[128,256], index: 5, kind: input, shape index: {}]   ;;  %s4676_s6 = inlined_call_operand.vmem [shape: f32[1,128], index: 6, kind: input, shape index: {}]   ;;  %s4677_s7 = inlined_call_operand.vmem [shape: f32[1,128], index: 7, kind: input, shape index: {}]   ;;  %s4678_s8 = inlined_call_operand.hbm [shape: f32[1,1], index: 8, kind: output, shape index: {}]  }
   0x1   :  { %14 = vsyncpa [#allocation4], 0  ;;  %s4035_s27 = smov [#allocation2]   ;;  %s3987_s9 = scalar_lea.hbm %s4671_s1, 28672 }
   0x2   :  { %s22_s28 = sshll.u32 %s4035_s27, 4  ;;  %p3988_p0 = scmp.ne.s32.totalorder %s4671_s1, %s3987_s9  ;;  %s23_s28 = int_to_ptr.vmem [resolvable:$true] %s22_s28 }
   0x3   :  { %p3991_p1 = scmp.lt.u32.totalorder %s3987_s9, %s4671_s1 }
   0x5   :  { %p3993_p2 = pnand %p3991_p1, %p3988_p0 }
   0x7   :  { %3996 = shalt.err (!%p3993_p2)
}
   0x8   :  { %s3997_s14 = scalar_lea.vmem %s23_s28, 28672  ;;  %p4002_p4 = scmp.lt.s32.totalorder %s23_s28, %s23_s28 }
   0x9   :  { %p3998_p3 = scmp.ne.s32.totalorder %s23_s28, %s3997_s14  ;;  %p4003_p5 = scmp.lt.s32.totalorder %s3997_s14, %s3997_s14 }
   0xb   :  { %p4004_p6 = por %p4003_p5, %p4002_p4 }
   0xd   :  { %p4005_p7 = pnand %p4004_p6, %p3998_p3 }
   0xf   :  { %4008 = shalt.err (!%p4005_p7)
}
  0x10   :  { %s4036_s15 = smov 256   ;;  %s4037_s16 = smov 16  }
  0x11   :  { %28 = dma.hbm_to_vmem [thread:$0]  %s4671_s1, 28672, %s23_s28, [#allocation3], %s4036_s15, %s4036_s15, %s4037_s16  }
  0x12   :  { %4031 = dma.done.wait [#allocation3], 28672  }
  0x13   :  { %4032 = vsyncadd [#allocation3], 4294938624  ;;  %v3546_v0 = vld [vmem:[#allocation2 + $0x4] ss:$16 sps:$4 sm:$0xff]   ;;  %v3548_v1 = vld [vmem:[#allocation2 + $0xc] ss:$16 sps:$4 sm:$0xff]  }
  0x14   :  { %1418 = vmatprep.subr.bf16.mxu0 %v3546_v0  ;;  %v3550_v2 = vld [vmem:[#allocation2] ss:$16 sps:$4 sm:$0xff]   ;;  %v3551_v3 = vld [vmem:[#allocation2 + $0x8] ss:$16 sps:$4 sm:$0xff]   ;;  %1582 = vmatprep.subr.bf16.mxu1 %v3548_v1  ;;  %v3552_v4 = vld [vmem:[#allocation2 + $0x24] ss:$16 sps:$4 sm:$0xff]  }
  0x15   :  { %1419 = vmatpush1.bf16.msra.mxu0 %v3550_v2  ;;  %1583 = vmatpush1.bf16.msra.mxu1 %v3551_v3  ;;  %v3554_v5 = vld [vmem:[#allocation2 + $0x2c] ss:$16 sps:$4 sm:$0xff]   ;;  %v3556_v6 = vld [vmem:[#allocation2 + $0x20] ss:$16 sps:$4 sm:$0xff]   ;;  %v3557_v7 = vld [vmem:[#allocation2 + $0x28] ss:$16 sps:$4 sm:$0xff]  }
  0x16   :  { %1420 = vmatprep.subr.bf16.mxu0 %v3552_v4  ;;  %1584 = vmatprep.subr.bf16.mxu1 %v3554_v5  ;;  %v3558_v8 = vld [vmem:[#allocation2 + $0x44] ss:$16 sps:$4 sm:$0xff]   ;;  %v3560_v9 = vld [vmem:[#allocation2 + $0x4c] ss:$16 sps:$4 sm:$0xff]   ;;  %v3562_v10 = vld [vmem:[#allocation2 + $0x40] ss:$16 sps:$4 sm:$0xff]  }
  0x17   :  { %v3563_v11 = vld [vmem:[#allocation2 + $0x48] ss:$16 sps:$4 sm:$0xff]   ;;  %v3564_v12 = vld [vmem:[#allocation2 + $0x64] ss:$16 sps:$4 sm:$0xff]   ;;  %v3566_v13 = vld [vmem:[#allocation2 + $0x6c] ss:$16 sps:$4 sm:$0xff]  }
  0x18   :  { %v3568_v14 = vld [vmem:[#allocation2 + $0x60] ss:$16 sps:$4 sm:$0xff]   ;;  %v3569_v15 = vld [vmem:[#allocation2 + $0x68] ss:$16 sps:$4 sm:$0xff]   ;;  %v3570_v16 = vld [vmem:[#allocation2 + $0x84] ss:$16 sps:$4 sm:$0xff]  }
  0x19   :  { %1421 = vmatpush1.bf16.msra.mxu0 %v3556_v6  ;;  %1585 = vmatpush1.bf16.msra.mxu1 %v3557_v7  ;;  %v3572_v17 = vld [vmem:[#allocation2 + $0x8c] ss:$16 sps:$4 sm:$0xff]   ;;  %v3574_v18 = vld [vmem:[#allocation2 + $0x80] ss:$16 sps:$4 sm:$0xff]   ;;  %v3575_v19 = vld [vmem:[#allocation2 + $0x88] ss:$16 sps:$4 sm:$0xff]  }
  0x1a   :  { %1422 = vmatprep.subr.bf16.mxu0 %v3558_v8  ;;  %1586 = vmatprep.subr.bf16.mxu1 %v3560_v9  ;;  %v3576_v20 = vld [vmem:[#allocation2 + $0xa4] ss:$16 sps:$4 sm:$0xff]   ;;  %v3578_v21 = vld [vmem:[#allocation2 + $0xac] ss:$16 sps:$4 sm:$0xff]   ;;  %v3580_v22 = vld [vmem:[#allocation2 + $0xa0] ss:$16 sps:$4 sm:$0xff]  }
  0x1b   :  { %v3581_v23 = vld [vmem:[#allocation2 + $0xa8] ss:$16 sps:$4 sm:$0xff]   ;;  %v3582_v24 = vld [vmem:[#allocation2 + $0xc4] ss:$16 sps:$4 sm:$0xff]   ;;  %v3584_v25 = vld [vmem:[#allocation2 + $0xcc] ss:$16 sps:$4 sm:$0xff]  }
  0x1c   :  { %v3586_v26 = vld [vmem:[#allocation2 + $0xc0] ss:$16 sps:$4 sm:$0xff]   ;;  %v3587_v27 = vld [vmem:[#allocation2 + $0xc8] ss:$16 sps:$4 sm:$0xff]   ;;  %v3588_v28 = vld [vmem:[#allocation2 + $0xe4] ss:$16 sps:$4 sm:$0xff]  }
  0x1d   :  { %1423 = vmatpush1.bf16.msra.mxu0 %v3562_v10  ;;  %1587 = vmatpush1.bf16.msra.mxu1 %v3563_v11  ;;  %v3590_v29 = vld [vmem:[#allocation2 + $0xec] ss:$16 sps:$4 sm:$0xff]   ;;  %v3592_v30 = vld [vmem:[#allocation2 + $0xe0] ss:$16 sps:$4 sm:$0xff]   ;;  %v3593_v31 = vld [vmem:[#allocation2 + $0xe8] ss:$16 sps:$4 sm:$0xff]  }
  0x1e   :  { %1424 = vmatprep.subr.bf16.mxu0 %v3564_v12  ;;  %1588 = vmatprep.subr.bf16.mxu1 %v3566_v13  ;;  %v3594_v32 = vld [vmem:[#allocation2 + $0x104] ss:$16 sps:$4 sm:$0xff]   ;;  %v3596_v33 = vld [vmem:[#allocation2 + $0x10c] ss:$16 sps:$4 sm:$0xff]   ;;  %v3598_v34 = vld [vmem:[#allocation2 + $0x100] ss:$16 sps:$4 sm:$0xff]  }
  0x1f   :  { %v3599_v35 = vld [vmem:[#allocation2 + $0x108] ss:$16 sps:$4 sm:$0xff]   ;;  %v3600_v36 = vld [vmem:[#allocation2 + $0x124] ss:$16 sps:$4 sm:$0xff]   ;;  %v3602_v37 = vld [vmem:[#allocation2 + $0x12c] ss:$16 sps:$4 sm:$0xff]  }
  0x20   :  { %v3604_v38 = vld [vmem:[#allocation2 + $0x120] ss:$16 sps:$4 sm:$0xff]   ;;  %v3605_v39 = vld [vmem:[#allocation2 + $0x128] ss:$16 sps:$4 sm:$0xff]   ;;  %v3606_v40 = vld [vmem:[#allocation2 + $0x144] ss:$16 sps:$4 sm:$0xff]  }
  0x21   :  { %1425 = vmatpush1.bf16.msra.mxu0 %v3568_v14  ;;  %1589 = vmatpush1.bf16.msra.mxu1 %v3569_v15  ;;  %v3608_v41 = vld [vmem:[#allocation2 + $0x14c] ss:$16 sps:$4 sm:$0xff]   ;;  %v3610_v42 = vld [vmem:[#allocation2 + $0x140] ss:$16 sps:$4 sm:$0xff]   ;;  %v3611_v43 = vld [vmem:[#allocation2 + $0x148] ss:$16 sps:$4 sm:$0xff]  }
  0x22   :  { %1426 = vmatprep.subr.bf16.mxu0 %v3570_v16  ;;  %1590 = vmatprep.subr.bf16.mxu1 %v3572_v17  ;;  %v3612_v44 = vld [vmem:[#allocation2 + $0x164] ss:$16 sps:$4 sm:$0xff]   ;;  %v3614_v45 = vld [vmem:[#allocation2 + $0x16c] ss:$16 sps:$4 sm:$0xff]   ;;  %v3616_v47 = vld [vmem:[#allocation2 + $0x160] ss:$16 sps:$4 sm:$0xff]  }
  0x23   :  { %v45_v46 = vld [vmem:[%s4670_s0] sm:$0xff]  ;;  %v3617_v49 = vld [vmem:[#allocation2 + $0x168] ss:$16 sps:$4 sm:$0xff]   ;;  %v3620_v51 = vld [vmem:[#allocation2 + $0x18c] ss:$16 sps:$4 sm:$0xff]   ;;  %vm2224_vm0 = vcmask 64512  }
  0x24   :  { %v2948_v48 = vcombine.high %v45_v46, %v45_v46  ;;  %v3618_v50 = vld [vmem:[#allocation2 + $0x184] ss:$16 sps:$4 sm:$0xff]   ;;  %v3622_v52 = vld [vmem:[#allocation2 + $0x180] ss:$16 sps:$4 sm:$0xff]   ;;  %v3623_v53 = vld [vmem:[#allocation2 + $0x188] ss:$16 sps:$4 sm:$0xff]   ;;  %v2947_v4 = vcombine.low %v45_v46, %v45_v46 }
  0x25   :  { %1427 = vmatpush1.bf16.msra.mxu0 %v3574_v18  ;;  %1591 = vmatpush1.bf16.msra.mxu1 %v3575_v19  ;;  %v3624_v54 = vld [vmem:[#allocation2 + $0x1a4] ss:$16 sps:$4 sm:$0xff]   ;;  %v3626_v55 = vld [vmem:[#allocation2 + $0x1ac] ss:$16 sps:$4 sm:$0xff]   ;;  %v3628_v56 = vld [vmem:[#allocation2 + $0x1a0] ss:$16 sps:$4 sm:$0xff]  }
  0x26   :  { %1428 = vmatprep.subr.bf16.mxu0 %v3576_v20  ;;  %1592 = vmatprep.subr.bf16.mxu1 %v3578_v21  ;;  %v3629_v57 = vld [vmem:[#allocation2 + $0x1a8] ss:$16 sps:$4 sm:$0xff]   ;;  %v3630_v58 = vld [vmem:[#allocation2 + $0x1c4] ss:$16 sps:$4 sm:$0xff]   ;;  %v3632_v59 = vld [vmem:[#allocation2 + $0x1cc] ss:$16 sps:$4 sm:$0xff]  }
  0x27   :  { %1450 = vmatprep.mubr.bf16.mxu0 %v2948_v48  ;;  %1614 = vmatprep.mubr.bf16.mxu1 %v2948_v48  ;;  %v3634_v60 = vld [vmem:[#allocation2 + $0x1c0] ss:$16 sps:$4 sm:$0xff]   ;;  %v3635_v61 = vld [vmem:[#allocation2 + $0x1c8] ss:$16 sps:$4 sm:$0xff]   ;;  %v3636_v62 = vld [vmem:[#allocation2 + $0x1e4] ss:$16 sps:$4 sm:$0xff]  }
  0x28   :  { %v3638_v63 = vld [vmem:[#allocation2 + $0x1ec] ss:$16 sps:$4 sm:$0xff]   ;;  %v3640_v0 = vld [vmem:[#allocation2 + $0x1e0] ss:$16 sps:$4 sm:$0xff]   ;;  %v3641_v1 = vld [vmem:[#allocation2 + $0x1e8] ss:$16 sps:$4 sm:$0xff]  }
  0x29   :  { %1429 = vmatpush1.bf16.msra.mxu0 %v3580_v22  ;;  %1593 = vmatpush1.bf16.msra.mxu1 %v3581_v23  ;;  %v3646_v2 = vld [vmem:[#allocation2 + $0x204] ss:$16 sps:$4 sm:$0xff]   ;;  %v3649_v3 = vld [vmem:[#allocation2 + $0x20c] ss:$16 sps:$4 sm:$0xff]   ;;  %v3644_v5 = vld [vmem:[#allocation2 + $0x200] ss:$16 sps:$4 sm:$0xff]  }
  0x2a   :  { %1430 = vmatprep.subr.bf16.mxu0 %v3582_v24  ;;  %1594 = vmatprep.subr.bf16.mxu1 %v3584_v25  ;;  %v3647_v6 = vld [vmem:[#allocation2 + $0x208] ss:$16 sps:$4 sm:$0xff]   ;;  %v3652_v7 = vld [vmem:[#allocation2 + $0x224] ss:$16 sps:$4 sm:$0xff]   ;;  %v3655_v8 = vld [vmem:[#allocation2 + $0x22c] ss:$16 sps:$4 sm:$0xff]  }
  0x2b   :  { %v3650_v9 = vld [vmem:[#allocation2 + $0x220] ss:$16 sps:$4 sm:$0xff]   ;;  %v3653_v10 = vld [vmem:[#allocation2 + $0x228] ss:$16 sps:$4 sm:$0xff]   ;;  %v3658_v11 = vld [vmem:[#allocation2 + $0x244] ss:$16 sps:$4 sm:$0xff]  }
  0x2c   :  { %v3661_v12 = vld [vmem:[#allocation2 + $0x24c] ss:$16 sps:$4 sm:$0xff]   ;;  %v3656_v13 = vld [vmem:[#allocation2 + $0x240] ss:$16 sps:$4 sm:$0xff]   ;;  %v3659_v14 = vld [vmem:[#allocation2 + $0x248] ss:$16 sps:$4 sm:$0xff]  }
  0x2d   :  { %1431 = vmatpush1.bf16.msra.mxu0 %v3586_v26  ;;  %1595 = vmatpush1.bf16.msra.mxu1 %v3587_v27  ;;  %v3664_v15 = vld [vmem:[#allocation2 + $0x264] ss:$16 sps:$4 sm:$0xff]   ;;  %v3667_v16 = vld [vmem:[#allocation2 + $0x26c] ss:$16 sps:$4 sm:$0xff]   ;;  %v3662_v17 = vld [vmem:[#allocation2 + $0x260] ss:$16 sps:$4 sm:$0xff]  }
  0x2e   :  { %1432 = vmatprep.subr.bf16.mxu0 %v3588_v28  ;;  %1596 = vmatprep.subr.bf16.mxu1 %v3590_v29  ;;  %v3665_v18 = vld [vmem:[#allocation2 + $0x268] ss:$16 sps:$4 sm:$0xff]   ;;  %v3670_v19 = vld [vmem:[#allocation2 + $0x284] ss:$16 sps:$4 sm:$0xff]   ;;  %v3673_v20 = vld [vmem:[#allocation2 + $0x28c] ss:$16 sps:$4 sm:$0xff]  }
  0x2f   :  { %v3668_v21 = vld [vmem:[#allocation2 + $0x280] ss:$16 sps:$4 sm:$0xff]   ;;  %v3671_v22 = vld [vmem:[#allocation2 + $0x288] ss:$16 sps:$4 sm:$0xff]   ;;  %v3676_v23 = vld [vmem:[#allocation2 + $0x2a4] ss:$16 sps:$4 sm:$0xff]  }
  0x30   :  { %v3679_v24 = vld [vmem:[#allocation2 + $0x2ac] ss:$16 sps:$4 sm:$0xff]   ;;  %v3674_v25 = vld [vmem:[#allocation2 + $0x2a0] ss:$16 sps:$4 sm:$0xff]   ;;  %v3677_v26 = vld [vmem:[#allocation2 + $0x2a8] ss:$16 sps:$4 sm:$0xff]  }
  0x31   :  { %1433 = vmatpush1.bf16.msra.mxu0 %v3592_v30  ;;  %1597 = vmatpush1.bf16.msra.mxu1 %v3593_v31  ;;  %v3682_v27 = vld [vmem:[#allocation2 + $0x2c4] ss:$16 sps:$4 sm:$0xff]   ;;  %v3685_v28 = vld [vmem:[#allocation2 + $0x2cc] ss:$16 sps:$4 sm:$0xff]   ;;  %v3680_v31 = vld [vmem:[#allocation2 + $0x2c0] ss:$16 sps:$4 sm:$0xff]  }
  0x32   :  { %1434 = vmatprep.subr.bf16.mxu0 %v3594_v32  ;;  %1598 = vmatprep.subr.bf16.mxu1 %v3596_v33  ;;  %v4106_v29 = vld [vmem:[%s4670_s0 + $0x8] sm:$0xff]  ;;  %v3688_v33 = vld [vmem:[#allocation2 + $0x2e4] ss:$16 sps:$4 sm:$0xff]   ;;  %s4042_s18 = smov [#allocation5]   ;;  %vm2930_vm1 = vcmask 0  }
  0x33   :  { %v2950_v30 = vcombine.high %v4106_v29, %v4106_v29  ;;  %v3683_v32 = vld [vmem:[#allocation2 + $0x2c8] ss:$16 sps:$4 sm:$0xff]   ;;  %v3709_v46 = vld [vmem:[#allocation2 + $0x34c] ss:$16 sps:$4 sm:$0xff]  }
  0x34   :  { %v3707_v48 = vld [vmem:[#allocation2 + $0x348] ss:$16 sps:$4 sm:$0xff]  }
  0x35   :  { %1435 = vmatpush1.bf16.msra.mxu0 %v3598_v34  ;;  %1599 = vmatpush1.bf16.msra.mxu1 %v3599_v35  ;;  %v3691_v34 = vld [vmem:[#allocation2 + $0x2ec] ss:$16 sps:$4 sm:$0xff]   ;;  %v3686_v35 = vld [vmem:[#allocation2 + $0x2e0] ss:$16 sps:$4 sm:$0xff]  }
  0x36   :  { %1436 = vmatprep.subr.bf16.mxu0 %v3600_v36  ;;  %1600 = vmatprep.subr.bf16.mxu1 %v3602_v37  ;;  %v3689_v36 = vld [vmem:[#allocation2 + $0x2e8] ss:$16 sps:$4 sm:$0xff]   ;;  %v3694_v37 = vld [vmem:[#allocation2 + $0x304] ss:$16 sps:$4 sm:$0xff]  }
  0x39   :  { %1437 = vmatpush1.bf16.msra.mxu0 %v3604_v38  ;;  %1601 = vmatpush1.bf16.msra.mxu1 %v3605_v39  ;;  %v3697_v38 = vld [vmem:[#allocation2 + $0x30c] ss:$16 sps:$4 sm:$0xff]   ;;  %v3692_v39 = vld [vmem:[#allocation2 + $0x300] ss:$16 sps:$4 sm:$0xff]  }
  0x3a   :  { %1438 = vmatprep.subr.bf16.mxu0 %v3606_v40  ;;  %1602 = vmatprep.subr.bf16.mxu1 %v3608_v41  ;;  %v3695_v40 = vld [vmem:[#allocation2 + $0x308] ss:$16 sps:$4 sm:$0xff]   ;;  %v3700_v41 = vld [vmem:[#allocation2 + $0x324] ss:$16 sps:$4 sm:$0xff]  }
  0x3d   :  { %1439 = vmatpush1.bf16.msra.mxu0 %v3610_v42  ;;  %1603 = vmatpush1.bf16.msra.mxu1 %v3611_v43  ;;  %v3703_v42 = vld [vmem:[#allocation2 + $0x32c] ss:$16 sps:$4 sm:$0xff]   ;;  %v3698_v43 = vld [vmem:[#allocation2 + $0x320] ss:$16 sps:$4 sm:$0xff]  }
  0x3e   :  { %1440 = vmatprep.subr.bf16.mxu0 %v3612_v44  ;;  %1604 = vmatprep.subr.bf16.mxu1 %v3614_v45  ;;  %v3701_v44 = vld [vmem:[#allocation2 + $0x328] ss:$16 sps:$4 sm:$0xff]   ;;  %v3706_v45 = vld [vmem:[#allocation2 + $0x344] ss:$16 sps:$4 sm:$0xff]  }
  0x41   :  { %1441 = vmatpush1.bf16.msra.mxu0 %v3616_v47  ;;  %1605 = vmatpush1.bf16.msra.mxu1 %v3617_v49  ;;  %v3704_v47 = vld [vmem:[#allocation2 + $0x340] ss:$16 sps:$4 sm:$0xff]   ;;  %v3712_v49 = vld [vmem:[#allocation2 + $0x364] ss:$16 sps:$4 sm:$0xff]  }
  0x42   :  { %1442 = vmatprep.subr.bf16.mxu0 %v3618_v50  ;;  %1606 = vmatprep.subr.bf16.mxu1 %v3620_v51  ;;  %v3715_v50 = vld [vmem:[#allocation2 + $0x36c] ss:$16 sps:$4 sm:$0xff]   ;;  %v3710_v51 = vld [vmem:[#allocation2 + $0x360] ss:$16 sps:$4 sm:$0xff]  }
  0x45   :  { %1443 = vmatpush1.bf16.msra.mxu0 %v3622_v52  ;;  %1607 = vmatpush1.bf16.msra.mxu1 %v3623_v53  ;;  %v3713_v52 = vld [vmem:[#allocation2 + $0x368] ss:$16 sps:$4 sm:$0xff]   ;;  %v3718_v53 = vld [vmem:[#allocation2 + $0x384] ss:$16 sps:$4 sm:$0xff]  }
  0x46   :  { %1444 = vmatprep.subr.bf16.mxu0 %v3624_v54  ;;  %1608 = vmatprep.subr.bf16.mxu1 %v3626_v55  ;;  %v3721_v54 = vld [vmem:[#allocation2 + $0x38c] ss:$16 sps:$4 sm:$0xff]   ;;  %v3716_v55 = vld [vmem:[#allocation2 + $0x380] ss:$16 sps:$4 sm:$0xff]  }
  0x49   :  { %1445 = vmatpush1.bf16.msra.mxu0 %v3628_v56  ;;  %1609 = vmatpush1.bf16.msra.mxu1 %v3629_v57  ;;  %v3719_v56 = vld [vmem:[#allocation2 + $0x388] ss:$16 sps:$4 sm:$0xff]   ;;  %v3724_v57 = vld [vmem:[#allocation2 + $0x3a4] ss:$16 sps:$4 sm:$0xff]  }
  0x4a   :  { %1446 = vmatprep.subr.bf16.mxu0 %v3630_v58  ;;  %1610 = vmatprep.subr.bf16.mxu1 %v3632_v59  ;;  %v3727_v58 = vld [vmem:[#allocation2 + $0x3ac] ss:$16 sps:$4 sm:$0xff]   ;;  %v3722_v59 = vld [vmem:[#allocation2 + $0x3a0] ss:$16 sps:$4 sm:$0xff]  }
  0x4d   :  { %1447 = vmatpush1.bf16.msra.mxu0 %v3634_v60  ;;  %1611 = vmatpush1.bf16.msra.mxu1 %v3635_v61  ;;  %v3725_v60 = vld [vmem:[#allocation2 + $0x3a8] ss:$16 sps:$4 sm:$0xff]   ;;  %v3730_v61 = vld [vmem:[#allocation2 + $0x3c4] ss:$16 sps:$4 sm:$0xff]  }
  0x4e   :  { %1448 = vmatprep.subr.bf16.mxu0 %v3636_v62  ;;  %1612 = vmatprep.subr.bf16.mxu1 %v3638_v63  ;;  %v3733_v62 = vld [vmem:[#allocation2 + $0x3cc] ss:$16 sps:$4 sm:$0xff]   ;;  %v3728_v63 = vld [vmem:[#allocation2 + $0x3c0] ss:$16 sps:$4 sm:$0xff]  }
  0x51   :  { %1449 = vmatpush1.bf16.msra.mxu0 %v3640_v0  ;;  %1613 = vmatpush1.bf16.msra.mxu1 %v3641_v1  ;;  %v3731_v0 = vld [vmem:[#allocation2 + $0x3c8] ss:$16 sps:$4 sm:$0xff]   ;;  %v3736_v1 = vld [vmem:[#allocation2 + $0x3e4] ss:$16 sps:$4 sm:$0xff]  }
  0x52   :  { %1459 = vmatprep.subr.bf16.mxu0 %v3646_v2  ;;  %1623 = vmatprep.subr.bf16.mxu1 %v3649_v3  ;;  %v3739_v2 = vld [vmem:[#allocation2 + $0x3ec] ss:$16 sps:$4 sm:$0xff]   ;;  %v3734_v3 = vld [vmem:[#allocation2 + $0x3e0] ss:$16 sps:$4 sm:$0xff]  }
  0x54   :  { %1451 = vmatmul.mubr.bf16.vlgmr.msra.gmra.mrb[0].mxu0 %v2947_v4  ;;  %1615 = vmatmul.mubr.bf16.vlgmr.msra.gmra.mrb[0].mxu1 %v2947_v4  ;;  %v3737_v4 = vld [vmem:[#allocation2 + $0x3e8] ss:$16 sps:$4 sm:$0xff]  }
  0x55   :  { %1460 = vmatpush1.bf16.msra.mxu0 %v3644_v5  ;;  %1624 = vmatpush1.bf16.msra.mxu1 %v3647_v6  ;;  %v3744_v5 = vld [vmem:[#allocation2 + $0x404] ss:$16 sps:$4 sm:$0xff]   ;;  %v3747_v6 = vld [vmem:[#allocation2 + $0x40c] ss:$16 sps:$4 sm:$0xff]  }
  0x56   :  { %1461 = vmatprep.subr.bf16.mxu0 %v3652_v7  ;;  %1625 = vmatprep.subr.bf16.mxu1 %v3655_v8  ;;  %v2949_v7 = vcombine.low %v4106_v29, %v4106_v29  ;;  %v3742_v8 = vld [vmem:[#allocation2 + $0x400] ss:$16 sps:$4 sm:$0xff]   ;;  %v3777_v29 = vld [vmem:[#allocation2 + $0x4ac] ss:$16 sps:$4 sm:$0xff]  }
  0x57   :  { %1491 = vmatprep.mubr.bf16.mxu0 %v2950_v30  ;;  %1655 = vmatprep.mubr.bf16.mxu1 %v2950_v30  ;;  %v3772_v30 = vld [vmem:[#allocation2 + $0x4a0] ss:$16 sps:$4 sm:$0xff]  }
  0x59   :  { %1462 = vmatpush1.bf16.msra.mxu0 %v3650_v9  ;;  %1626 = vmatpush1.bf16.msra.mxu1 %v3653_v10  ;;  %v3745_v9 = vld [vmem:[#allocation2 + $0x408] ss:$16 sps:$4 sm:$0xff]   ;;  %v3750_v10 = vld [vmem:[#allocation2 + $0x424] ss:$16 sps:$4 sm:$0xff]  }
  0x5a   :  { %1463 = vmatprep.subr.bf16.mxu0 %v3658_v11  ;;  %1627 = vmatprep.subr.bf16.mxu1 %v3661_v12  ;;  %v4115_v11 = vld [vmem:[%s4670_s0 + $0x10] sm:$0xff]  ;;  %v3753_v12 = vld [vmem:[#allocation2 + $0x42c] ss:$16 sps:$4 sm:$0xff]  }
  0x5d   :  { %1464 = vmatpush1.bf16.msra.mxu0 %v3656_v13  ;;  %1628 = vmatpush1.bf16.msra.mxu1 %v3659_v14  ;;  %v2952_v13 = vcombine.high %v4115_v11, %v4115_v11  ;;  %v3748_v14 = vld [vmem:[#allocation2 + $0x420] ss:$16 sps:$4 sm:$0xff]  }
  0x5e   :  { %1465 = vmatprep.subr.bf16.mxu0 %v3664_v15  ;;  %1629 = vmatprep.subr.bf16.mxu1 %v3667_v16  ;;  %v3751_v15 = vld [vmem:[#allocation2 + $0x428] ss:$16 sps:$4 sm:$0xff]   ;;  %v3756_v16 = vld [vmem:[#allocation2 + $0x444] ss:$16 sps:$4 sm:$0xff]  }
  0x61   :  { %1466 = vmatpush1.bf16.msra.mxu0 %v3662_v17  ;;  %1630 = vmatpush1.bf16.msra.mxu1 %v3665_v18  ;;  %v3759_v17 = vld [vmem:[#allocation2 + $0x44c] ss:$16 sps:$4 sm:$0xff]   ;;  %v3754_v18 = vld [vmem:[#allocation2 + $0x440] ss:$16 sps:$4 sm:$0xff]  }
  0x62   :  { %1467 = vmatprep.subr.bf16.mxu0 %v3670_v19  ;;  %1631 = vmatprep.subr.bf16.mxu1 %v3673_v20  ;;  %v3757_v19 = vld [vmem:[#allocation2 + $0x448] ss:$16 sps:$4 sm:$0xff]   ;;  %v3762_v20 = vld [vmem:[#allocation2 + $0x464] ss:$16 sps:$4 sm:$0xff]  }
  0x65   :  { %1468 = vmatpush1.bf16.msra.mxu0 %v3668_v21  ;;  %1632 = vmatpush1.bf16.msra.mxu1 %v3671_v22  ;;  %v3765_v21 = vld [vmem:[#allocation2 + $0x46c] ss:$16 sps:$4 sm:$0xff]   ;;  %v3760_v22 = vld [vmem:[#allocation2 + $0x460] ss:$16 sps:$4 sm:$0xff]  }
  0x66   :  { %1469 = vmatprep.subr.bf16.mxu0 %v3676_v23  ;;  %1633 = vmatprep.subr.bf16.mxu1 %v3679_v24  ;;  %v3763_v23 = vld [vmem:[#allocation2 + $0x468] ss:$16 sps:$4 sm:$0xff]   ;;  %v3768_v24 = vld [vmem:[#allocation2 + $0x484] ss:$16 sps:$4 sm:$0xff]  }
  0x69   :  { %1470 = vmatpush1.bf16.msra.mxu0 %v3674_v25  ;;  %1634 = vmatpush1.bf16.msra.mxu1 %v3677_v26  ;;  %v3771_v25 = vld [vmem:[#allocation2 + $0x48c] ss:$16 sps:$4 sm:$0xff]   ;;  %v3766_v26 = vld [vmem:[#allocation2 + $0x480] ss:$16 sps:$4 sm:$0xff]  }
  0x6a   :  { %1471 = vmatprep.subr.bf16.mxu0 %v3682_v27  ;;  %1635 = vmatprep.subr.bf16.mxu1 %v3685_v28  ;;  %v3769_v27 = vld [vmem:[#allocation2 + $0x488] ss:$16 sps:$4 sm:$0xff]   ;;  %v3774_v28 = vld [vmem:[#allocation2 + $0x4a4] ss:$16 sps:$4 sm:$0xff]  }
  0x6d   :  { %1472 = vmatpush1.bf16.msra.mxu0 %v3680_v31  ;;  %1636 = vmatpush1.bf16.msra.mxu1 %v3683_v32  ;;  %v3775_v31 = vld [vmem:[#allocation2 + $0x4a8] ss:$16 sps:$4 sm:$0xff]   ;;  %v3780_v32 = vld [vmem:[#allocation2 + $0x4c4] ss:$16 sps:$4 sm:$0xff]  }
  0x6e   :  { %1473 = vmatprep.subr.bf16.mxu0 %v3688_v33  ;;  %1637 = vmatprep.subr.bf16.mxu1 %v3691_v34  ;;  %v3783_v33 = vld [vmem:[#allocation2 + $0x4cc] ss:$16 sps:$4 sm:$0xff]   ;;  %v3778_v34 = vld [vmem:[#allocation2 + $0x4c0] ss:$16 sps:$4 sm:$0xff]  }
  0x71   :  { %1474 = vmatpush1.bf16.msra.mxu0 %v3686_v35  ;;  %1638 = vmatpush1.bf16.msra.mxu1 %v3689_v36  ;;  %v3781_v35 = vld [vmem:[#allocation2 + $0x4c8] ss:$16 sps:$4 sm:$0xff]   ;;  %v3786_v36 = vld [vmem:[#allocation2 + $0x4e4] ss:$16 sps:$4 sm:$0xff]  }
  0x72   :  { %1475 = vmatprep.subr.bf16.mxu0 %v3694_v37  ;;  %1639 = vmatprep.subr.bf16.mxu1 %v3697_v38  ;;  %v3789_v37 = vld [vmem:[#allocation2 + $0x4ec] ss:$16 sps:$4 sm:$0xff]   ;;  %v3784_v38 = vld [vmem:[#allocation2 + $0x4e0] ss:$16 sps:$4 sm:$0xff]  }
  0x75   :  { %1476 = vmatpush1.bf16.msra.mxu0 %v3692_v39  ;;  %1640 = vmatpush1.bf16.msra.mxu1 %v3695_v40  ;;  %v3787_v39 = vld [vmem:[#allocation2 + $0x4e8] ss:$16 sps:$4 sm:$0xff]   ;;  %v3792_v40 = vld [vmem:[#allocation2 + $0x504] ss:$16 sps:$4 sm:$0xff]  }
  0x76   :  { %1477 = vmatprep.subr.bf16.mxu0 %v3700_v41  ;;  %1641 = vmatprep.subr.bf16.mxu1 %v3703_v42  ;;  %v3795_v41 = vld [vmem:[#allocation2 + $0x50c] ss:$16 sps:$4 sm:$0xff]   ;;  %v3790_v42 = vld [vmem:[#allocation2 + $0x500] ss:$16 sps:$4 sm:$0xff]  }
  0x79   :  { %1478 = vmatpush1.bf16.msra.mxu0 %v3698_v43  ;;  %1642 = vmatpush1.bf16.msra.mxu1 %v3701_v44  ;;  %v3793_v43 = vld [vmem:[#allocation2 + $0x508] ss:$16 sps:$4 sm:$0xff]   ;;  %v3798_v44 = vld [vmem:[#allocation2 + $0x524] ss:$16 sps:$4 sm:$0xff]  }
  0x7a   :  { %1479 = vmatprep.subr.bf16.mxu0 %v3706_v45  ;;  %1643 = vmatprep.subr.bf16.mxu1 %v3709_v46  ;;  %v3801_v45 = vld [vmem:[#allocation2 + $0x52c] ss:$16 sps:$4 sm:$0xff]   ;;  %v3796_v46 = vld [vmem:[#allocation2 + $0x520] ss:$16 sps:$4 sm:$0xff]  }
  0x7d   :  { %1480 = vmatpush1.bf16.msra.mxu0 %v3704_v47  ;;  %1644 = vmatpush1.bf16.msra.mxu1 %v3707_v48  ;;  %v3799_v47 = vld [vmem:[#allocation2 + $0x528] ss:$16 sps:$4 sm:$0xff]   ;;  %v3804_v48 = vld [vmem:[#allocation2 + $0x544] ss:$16 sps:$4 sm:$0xff]  }
  0x7e   :  { %1481 = vmatprep.subr.bf16.mxu0 %v3712_v49  ;;  %1645 = vmatprep.subr.bf16.mxu1 %v3715_v50  ;;  %v3807_v49 = vld [vmem:[#allocation2 + $0x54c] ss:$16 sps:$4 sm:$0xff]   ;;  %v3802_v50 = vld [vmem:[#allocation2 + $0x540] ss:$16 sps:$4 sm:$0xff]  }
  0x81   :  { %1482 = vmatpush1.bf16.msra.mxu0 %v3710_v51  ;;  %1646 = vmatpush1.bf16.msra.mxu1 %v3713_v52  ;;  %v3805_v51 = vld [vmem:[#allocation2 + $0x548] ss:$16 sps:$4 sm:$0xff]   ;;  %v3810_v52 = vld [vmem:[#allocation2 + $0x564] ss:$16 sps:$4 sm:$0xff]  }
  0x82   :  { %1483 = vmatprep.subr.bf16.mxu0 %v3718_v53  ;;  %1647 = vmatprep.subr.bf16.mxu1 %v3721_v54  ;;  %v3813_v53 = vld [vmem:[#allocation2 + $0x56c] ss:$16 sps:$4 sm:$0xff]   ;;  %v3808_v54 = vld [vmem:[#allocation2 + $0x560] ss:$16 sps:$4 sm:$0xff]  }
  0x85   :  { %1484 = vmatpush1.bf16.msra.mxu0 %v3716_v55  ;;  %1648 = vmatpush1.bf16.msra.mxu1 %v3719_v56  ;;  %v3811_v55 = vld [vmem:[#allocation2 + $0x568] ss:$16 sps:$4 sm:$0xff]   ;;  %v3816_v56 = vld [vmem:[#allocation2 + $0x584] ss:$16 sps:$4 sm:$0xff]  }
  0x86   :  { %1485 = vmatprep.subr.bf16.mxu0 %v3724_v57  ;;  %1649 = vmatprep.subr.bf16.mxu1 %v3727_v58  ;;  %v3819_v57 = vld [vmem:[#allocation2 + $0x58c] ss:$16 sps:$4 sm:$0xff]   ;;  %v3814_v58 = vld [vmem:[#allocation2 + $0x580] ss:$16 sps:$4 sm:$0xff]  }
  0x89   :  { %1486 = vmatpush1.bf16.msra.mxu0 %v3722_v59  ;;  %1650 = vmatpush1.bf16.msra.mxu1 %v3725_v60  ;;  %v3817_v59 = vld [vmem:[#allocation2 + $0x588] ss:$16 sps:$4 sm:$0xff]   ;;  %v3822_v60 = vld [vmem:[#allocation2 + $0x5a4] ss:$16 sps:$4 sm:$0xff]  }
  0x8a   :  { %1487 = vmatprep.subr.bf16.mxu0 %v3730_v61  ;;  %1651 = vmatprep.subr.bf16.mxu1 %v3733_v62  ;;  %v3825_v61 = vld [vmem:[#allocation2 + $0x5ac] ss:$16 sps:$4 sm:$0xff]   ;;  %v3820_v62 = vld [vmem:[#allocation2 + $0x5a0] ss:$16 sps:$4 sm:$0xff]  }
  0x8d   :  { %1488 = vmatpush1.bf16.msra.mxu0 %v3728_v63  ;;  %1652 = vmatpush1.bf16.msra.mxu1 %v3731_v0  ;;  %v3823_v63 = vld [vmem:[#allocation2 + $0x5a8] ss:$16 sps:$4 sm:$0xff]   ;;  %v3828_v0 = vld [vmem:[#allocation2 + $0x5c4] ss:$16 sps:$4 sm:$0xff]  }
  0x8e   :  { %1489 = vmatprep.subr.bf16.mxu0 %v3736_v1  ;;  %1653 = vmatprep.subr.bf16.mxu1 %v3739_v2  ;;  %v3831_v1 = vld [vmem:[#allocation2 + $0x5cc] ss:$16 sps:$4 sm:$0xff]   ;;  %v3826_v2 = vld [vmem:[#allocation2 + $0x5c0] ss:$16 sps:$4 sm:$0xff]  }
  0x91   :  { %1490 = vmatpush1.bf16.msra.mxu0 %v3734_v3  ;;  %1654 = vmatpush1.bf16.msra.mxu1 %v3737_v4  ;;  %v3829_v3 = vld [vmem:[#allocation2 + $0x5c8] ss:$16 sps:$4 sm:$0xff]   ;;  %v3834_v4 = vld [vmem:[#allocation2 + $0x5e4] ss:$16 sps:$4 sm:$0xff]  }
  0x92   :  { %1500 = vmatprep.subr.bf16.mxu0 %v3744_v5  ;;  %1664 = vmatprep.subr.bf16.mxu1 %v3747_v6  ;;  %v3837_v5 = vld [vmem:[#allocation2 + $0x5ec] ss:$16 sps:$4 sm:$0xff]   ;;  %v3832_v6 = vld [vmem:[#allocation2 + $0x5e0] ss:$16 sps:$4 sm:$0xff]  }
  0x94   :  { %1492 = vmatmul.mubr.bf16.vlgmr.msra.gmra.mrb[0].mxu0 %v2949_v7  ;;  %1656 = vmatmul.mubr.bf16.vlgmr.msra.gmra.mrb[0].mxu1 %v2949_v7  ;;  %v3835_v7 = vld [vmem:[#allocation2 + $0x5e8] ss:$16 sps:$4 sm:$0xff]  }
  0x95   :  { %1501 = vmatpush1.bf16.msra.mxu0 %v3742_v8  ;;  %1665 = vmatpush1.bf16.msra.mxu1 %v3745_v9  ;;  %v3842_v8 = vld [vmem:[#allocation2 + $0x604] ss:$16 sps:$4 sm:$0xff]   ;;  %v3845_v9 = vld [vmem:[#allocation2 + $0x60c] ss:$16 sps:$4 sm:$0xff]  }
  0x96   :  { %1502 = vmatprep.subr.bf16.mxu0 %v3750_v10  ;;  %1666 = vmatprep.subr.bf16.mxu1 %v3753_v12  ;;  %v2951_v10 = vcombine.low %v4115_v11, %v4115_v11  ;;  %v3840_v12 = vld [vmem:[#allocation2 + $0x600] ss:$16 sps:$4 sm:$0xff]  }
  0x97   :  { %1532 = vmatprep.mubr.bf16.mxu0 %v2952_v13  ;;  %1696 = vmatprep.mubr.bf16.mxu1 %v2952_v13  ;;  %v3843_v13 = vld [vmem:[#allocation2 + $0x608] ss:$16 sps:$4 sm:$0xff]   ;;  %v3852_v11 = vld [vmem:[#allocation2 + $0x640] ss:$16 sps:$4 sm:$0xff]  }
  0x99   :  { %1503 = vmatpush1.bf16.msra.mxu0 %v3748_v14  ;;  %1667 = vmatpush1.bf16.msra.mxu1 %v3751_v15  ;;  %v3848_v14 = vld [vmem:[#allocation2 + $0x624] ss:$16 sps:$4 sm:$0xff]   ;;  %v3851_v15 = vld [vmem:[#allocation2 + $0x62c] ss:$16 sps:$4 sm:$0xff]  }
  0x9a   :  { %1504 = vmatprep.subr.bf16.mxu0 %v3756_v16  ;;  %1668 = vmatprep.subr.bf16.mxu1 %v3759_v17  ;;  %v3846_v16 = vld [vmem:[#allocation2 + $0x620] ss:$16 sps:$4 sm:$0xff]   ;;  %v3849_v17 = vld [vmem:[#allocation2 + $0x628] ss:$16 sps:$4 sm:$0xff]  }
  0x9d   :  { %1505 = vmatpush1.bf16.msra.mxu0 %v3754_v18  ;;  %1669 = vmatpush1.bf16.msra.mxu1 %v3757_v19  ;;  %v3854_v18 = vld [vmem:[#allocation2 + $0x644] ss:$16 sps:$4 sm:$0xff]   ;;  %v3857_v19 = vld [vmem:[#allocation2 + $0x64c] ss:$16 sps:$4 sm:$0xff]  }
  0x9e   :  { %1506 = vmatprep.subr.bf16.mxu0 %v3762_v20  ;;  %1670 = vmatprep.subr.bf16.mxu1 %v3765_v21  ;;  %v4038_v20 = vmov 0   ;;  %v3855_v21 = vld [vmem:[#allocation2 + $0x648] ss:$16 sps:$4 sm:$0xff]  }
  0xa1   :  { %1507 = vmatpush1.bf16.msra.mxu0 %v3760_v22  ;;  %1671 = vmatpush1.bf16.msra.mxu1 %v3763_v23  ;;  %v3860_v22 = vld [vmem:[#allocation2 + $0x664] ss:$16 sps:$4 sm:$0xff]   ;;  %v3863_v23 = vld [vmem:[#allocation2 + $0x66c] ss:$16 sps:$4 sm:$0xff]  }
  0xa2   :  { %1508 = vmatprep.subr.bf16.mxu0 %v3768_v24  ;;  %1672 = vmatprep.subr.bf16.mxu1 %v3771_v25  ;;  %v3858_v24 = vld [vmem:[#allocation2 + $0x660] ss:$16 sps:$4 sm:$0xff]   ;;  %v3861_v25 = vld [vmem:[#allocation2 + $0x668] ss:$16 sps:$4 sm:$0xff]  }
  0xa5   :  { %1509 = vmatpush1.bf16.msra.mxu0 %v3766_v26  ;;  %1673 = vmatpush1.bf16.msra.mxu1 %v3769_v27  ;;  %v3866_v26 = vld [vmem:[#allocation2 + $0x684] ss:$16 sps:$4 sm:$0xff]   ;;  %v3869_v27 = vld [vmem:[#allocation2 + $0x68c] ss:$16 sps:$4 sm:$0xff]  }
  0xa6   :  { %1510 = vmatprep.subr.bf16.mxu0 %v3774_v28  ;;  %1674 = vmatprep.subr.bf16.mxu1 %v3777_v29  ;;  %v3864_v28 = vld [vmem:[#allocation2 + $0x680] ss:$16 sps:$4 sm:$0xff]   ;;  %v3867_v29 = vld [vmem:[#allocation2 + $0x688] ss:$16 sps:$4 sm:$0xff]  }
  0xa9   :  { %1511 = vmatpush1.bf16.msra.mxu0 %v3772_v30  ;;  %1675 = vmatpush1.bf16.msra.mxu1 %v3775_v31  ;;  %v3872_v30 = vld [vmem:[#allocation2 + $0x6a4] ss:$16 sps:$4 sm:$0xff]   ;;  %v3875_v31 = vld [vmem:[#allocation2 + $0x6ac] ss:$16 sps:$4 sm:$0xff]  }
  0xaa   :  { %1512 = vmatprep.subr.bf16.mxu0 %v3780_v32  ;;  %1676 = vmatprep.subr.bf16.mxu1 %v3783_v33  ;;  %v3870_v32 = vld [vmem:[#allocation2 + $0x6a0] ss:$16 sps:$4 sm:$0xff]   ;;  %v3873_v33 = vld [vmem:[#allocation2 + $0x6a8] ss:$16 sps:$4 sm:$0xff]  }
  0xad   :  { %1513 = vmatpush1.bf16.msra.mxu0 %v3778_v34  ;;  %1677 = vmatpush1.bf16.msra.mxu1 %v3781_v35  ;;  %v3878_v34 = vld [vmem:[#allocation2 + $0x6c4] ss:$16 sps:$4 sm:$0xff]   ;;  %v3881_v35 = vld [vmem:[#allocation2 + $0x6cc] ss:$16 sps:$4 sm:$0xff]  }
  0xae   :  { %1514 = vmatprep.subr.bf16.mxu0 %v3786_v36  ;;  %1678 = vmatprep.subr.bf16.mxu1 %v3789_v37  ;;  %v3876_v36 = vld [vmem:[#allocation2 + $0x6c0] ss:$16 sps:$4 sm:$0xff]   ;;  %v3879_v37 = vld [vmem:[#allocation2 + $0x6c8] ss:$16 sps:$4 sm:$0xff]  }
  0xb1   :  { %1515 = vmatpush1.bf16.msra.mxu0 %v3784_v38  ;;  %1679 = vmatpush1.bf16.msra.mxu1 %v3787_v39  ;;  %v3884_v38 = vld [vmem:[#allocation2 + $0x6e4] ss:$16 sps:$4 sm:$0xff]   ;;  %v3887_v39 = vld [vmem:[#allocation2 + $0x6ec] ss:$16 sps:$4 sm:$0xff]  }
  0xb2   :  { %1516 = vmatprep.subr.bf16.mxu0 %v3792_v40  ;;  %1680 = vmatprep.subr.bf16.mxu1 %v3795_v41  ;;  %v3882_v40 = vld [vmem:[#allocation2 + $0x6e0] ss:$16 sps:$4 sm:$0xff]   ;;  %v3885_v41 = vld [vmem:[#allocation2 + $0x6e8] ss:$16 sps:$4 sm:$0xff]  }
  0xb5   :  { %1517 = vmatpush1.bf16.msra.mxu0 %v3790_v42  ;;  %1681 = vmatpush1.bf16.msra.mxu1 %v3793_v43  ;;  %v3891_v42 = vld [vmem:[%s4672_s2 + $0x4] ss:$8 sps:$4 sm:$0xff]   ;;  %v3888_v43 = vld [vmem:[%s4670_s0 + $0x18] ss:$0 sps:$4 sm:$0xff]  }
  0xb6   :  { %1518 = vmatprep.subr.bf16.mxu0 %v3798_v44  ;;  %1682 = vmatprep.subr.bf16.mxu1 %v3801_v45  ;;  %v3889_v44 = vld [vmem:[%s4672_s2] ss:$8 sps:$4 sm:$0xff]   ;;  %v3894_v45 = vld [vmem:[%s4672_s2 + $0x14] ss:$8 sps:$4 sm:$0xff]  }
  0xb9   :  { %1519 = vmatpush1.bf16.msra.mxu0 %v3796_v46  ;;  %1683 = vmatpush1.bf16.msra.mxu1 %v3799_v47  ;;  %v3892_v46 = vld [vmem:[%s4672_s2 + $0x10] ss:$8 sps:$4 sm:$0xff]   ;;  %v3897_v47 = vld [vmem:[%s4672_s2 + $0x24] ss:$8 sps:$4 sm:$0xff]  }
  0xba   :  { %1520 = vmatprep.subr.bf16.mxu0 %v3804_v48  ;;  %1684 = vmatprep.subr.bf16.mxu1 %v3807_v49  ;;  %v3895_v48 = vld [vmem:[%s4672_s2 + $0x20] ss:$8 sps:$4 sm:$0xff]   ;;  %v3900_v49 = vld [vmem:[%s4672_s2 + $0x34] ss:$8 sps:$4 sm:$0xff]  }
  0xbd   :  { %1521 = vmatpush1.bf16.msra.mxu0 %v3802_v50  ;;  %1685 = vmatpush1.bf16.msra.mxu1 %v3805_v51  ;;  %v3898_v50 = vld [vmem:[%s4672_s2 + $0x30] ss:$8 sps:$4 sm:$0xff]   ;;  %v3903_v51 = vld [vmem:[%s4672_s2 + $0x44] ss:$8 sps:$4 sm:$0xff]  }
  0xbe   :  { %1522 = vmatprep.subr.bf16.mxu0 %v3810_v52  ;;  %1686 = vmatprep.subr.bf16.mxu1 %v3813_v53  ;;  %v3901_v52 = vld [vmem:[%s4672_s2 + $0x40] ss:$8 sps:$4 sm:$0xff]   ;;  %v3906_v53 = vld [vmem:[%s4672_s2 + $0x54] ss:$8 sps:$4 sm:$0xff]  }
  0xc1   :  { %1523 = vmatpush1.bf16.msra.mxu0 %v3808_v54  ;;  %1687 = vmatpush1.bf16.msra.mxu1 %v3811_v55  ;;  %v3904_v54 = vld [vmem:[%s4672_s2 + $0x50] ss:$8 sps:$4 sm:$0xff]   ;;  %v3909_v55 = vld [vmem:[%s4672_s2 + $0x64] ss:$8 sps:$4 sm:$0xff]  }
  0xc2   :  { %1524 = vmatprep.subr.bf16.mxu0 %v3816_v56  ;;  %1688 = vmatprep.subr.bf16.mxu1 %v3819_v57  ;;  %v3907_v56 = vld [vmem:[%s4672_s2 + $0x60] ss:$8 sps:$4 sm:$0xff]   ;;  %v3912_v57 = vld [vmem:[%s4672_s2 + $0x74] ss:$8 sps:$4 sm:$0xff]  }
  0xc5   :  { %1525 = vmatpush1.bf16.msra.mxu0 %v3814_v58  ;;  %1689 = vmatpush1.bf16.msra.mxu1 %v3817_v59  ;;  %v3910_v58 = vld [vmem:[%s4672_s2 + $0x70] ss:$8 sps:$4 sm:$0xff]   ;;  %v3915_v59 = vld [vmem:[%s4672_s2 + $0x84] ss:$8 sps:$4 sm:$0xff]  }
  0xc6   :  { %1526 = vmatprep.subr.bf16.mxu0 %v3822_v60  ;;  %1690 = vmatprep.subr.bf16.mxu1 %v3825_v61  ;;  %v3913_v60 = vld [vmem:[%s4672_s2 + $0x80] ss:$8 sps:$4 sm:$0xff]   ;;  %v3918_v61 = vld [vmem:[%s4672_s2 + $0x94] ss:$8 sps:$4 sm:$0xff]  }
  0xc9   :  { %1527 = vmatpush1.bf16.msra.mxu0 %v3820_v62  ;;  %1691 = vmatpush1.bf16.msra.mxu1 %v3823_v63  ;;  %v3916_v62 = vld [vmem:[%s4672_s2 + $0x90] ss:$8 sps:$4 sm:$0xff]   ;;  %v3921_v63 = vld [vmem:[%s4672_s2 + $0xa4] ss:$8 sps:$4 sm:$0xff]  }
  0xca   :  { %1528 = vmatprep.subr.bf16.mxu0 %v3828_v0  ;;  %1692 = vmatprep.subr.bf16.mxu1 %v3831_v1  ;;  %v3919_v0 = vld [vmem:[%s4672_s2 + $0xa0] ss:$8 sps:$4 sm:$0xff]   ;;  %v3924_v1 = vld [vmem:[%s4672_s2 + $0xb4] ss:$8 sps:$4 sm:$0xff]  }
  0xcd   :  { %1529 = vmatpush1.bf16.msra.mxu0 %v3826_v2  ;;  %1693 = vmatpush1.bf16.msra.mxu1 %v3829_v3  ;;  %v3922_v2 = vld [vmem:[%s4672_s2 + $0xb0] ss:$8 sps:$4 sm:$0xff]   ;;  %v3927_v3 = vld [vmem:[%s4672_s2 + $0xc4] ss:$8 sps:$4 sm:$0xff]  }
  0xce   :  { %1530 = vmatprep.subr.bf16.mxu0 %v3834_v4  ;;  %1694 = vmatprep.subr.bf16.mxu1 %v3837_v5  ;;  %v3925_v4 = vld [vmem:[%s4672_s2 + $0xc0] ss:$8 sps:$4 sm:$0xff]   ;;  %v3930_v5 = vld [vmem:[%s4672_s2 + $0xd4] ss:$8 sps:$4 sm:$0xff]  }
  0xd1   :  { %1531 = vmatpush1.bf16.msra.mxu0 %v3832_v6  ;;  %1695 = vmatpush1.bf16.msra.mxu1 %v3835_v7  ;;  %v3928_v6 = vld [vmem:[%s4672_s2 + $0xd0] ss:$8 sps:$4 sm:$0xff]   ;;  %v3933_v7 = vld [vmem:[%s4672_s2 + $0xe4] ss:$8 sps:$4 sm:$0xff]  }
  0xd2   :  { %1541 = vmatprep.subr.bf16.mxu0 %v3842_v8  ;;  %1705 = vmatprep.subr.bf16.mxu1 %v3845_v9  ;;  %v3931_v8 = vld [vmem:[%s4672_s2 + $0xe0] ss:$8 sps:$4 sm:$0xff]   ;;  %v3936_v9 = vld [vmem:[%s4672_s2 + $0xf4] ss:$8 sps:$4 sm:$0xff]  }
  0xd4   :  { %1533 = vmatmul.mubr.bf16.vlgmr.msra.gmra.mrb[0].mxu0 %v2951_v10  ;;  %1697 = vmatmul.mubr.bf16.vlgmr.msra.gmra.mrb[0].mxu1 %v2951_v10  ;;  %v3934_v10 = vld [vmem:[%s4672_s2 + $0xf0] ss:$8 sps:$4 sm:$0xff]  }
  0xd5   :  { %1542 = vmatpush1.bf16.msra.mxu0 %v3840_v12  ;;  %1706 = vmatpush1.bf16.msra.mxu1 %v3843_v13  ;;  %v3939_v12 = vld [vmem:[%s4672_s2 + $0x104] ss:$8 sps:$4 sm:$0xff]  }
  0xd6   :  { %1543 = vmatprep.subr.bf16.mxu0 %v3848_v14  ;;  %1707 = vmatprep.subr.bf16.mxu1 %v3851_v15 }
  0xd7   :  { %1573 = vmatprep.mubr.bf16.mxu0 %v4038_v20  ;;  %1737 = vmatprep.mubr.bf16.mxu1 %v4038_v20 }
  0xd9   :  { %1544 = vmatpush1.bf16.msra.mxu0 %v3846_v16  ;;  %1708 = vmatpush1.bf16.msra.mxu1 %v3849_v17 }
  0xda   :  { %1545 = vmatprep.subr.bf16.mxu0 %v3854_v18  ;;  %1709 = vmatprep.subr.bf16.mxu1 %v3857_v19 }
  0xdd   :  { %1546 = vmatpush1.bf16.msra.mxu0 %v3852_v11  ;;  %1710 = vmatpush1.bf16.msra.mxu1 %v3855_v21 }
  0xde   :  { %1547 = vmatprep.subr.bf16.mxu0 %v3860_v22  ;;  %1711 = vmatprep.subr.bf16.mxu1 %v3863_v23 }
  0xe1   :  { %1548 = vmatpush1.bf16.msra.mxu0 %v3858_v24  ;;  %1712 = vmatpush1.bf16.msra.mxu1 %v3861_v25 }
  0xe2   :  { %1549 = vmatprep.subr.bf16.mxu0 %v3866_v26  ;;  %1713 = vmatprep.subr.bf16.mxu1 %v3869_v27  ;;  %v3937_v27 = vld [vmem:[%s4672_s2 + $0x100] ss:$8 sps:$4 sm:$0xff]  }
  0xe5   :  { %1550 = vmatpush1.bf16.msra.mxu0 %v3864_v28  ;;  %1714 = vmatpush1.bf16.msra.mxu1 %v3867_v29  ;;  %v3942_v29 = vld [vmem:[%s4672_s2 + $0x114] ss:$8 sps:$4 sm:$0xff]  }
  0xe6   :  { %1551 = vmatprep.subr.bf16.mxu0 %v3872_v30  ;;  %1715 = vmatprep.subr.bf16.mxu1 %v3875_v31  ;;  %v3940_v31 = vld [vmem:[%s4672_s2 + $0x110] ss:$8 sps:$4 sm:$0xff]  }
  0xe9   :  { %1552 = vmatpush1.bf16.msra.mxu0 %v3870_v32  ;;  %1716 = vmatpush1.bf16.msra.mxu1 %v3873_v33  ;;  %v3945_v32 = vld [vmem:[%s4672_s2 + $0x124] ss:$8 sps:$4 sm:$0xff]   ;;  %v3943_v33 = vld [vmem:[%s4672_s2 + $0x120] ss:$8 sps:$4 sm:$0xff]  }
  0xea   :  { %1553 = vmatprep.subr.bf16.mxu0 %v3878_v34  ;;  %1717 = vmatprep.subr.bf16.mxu1 %v3881_v35  ;;  %v3948_v34 = vld [vmem:[%s4672_s2 + $0x134] ss:$8 sps:$4 sm:$0xff]   ;;  %v3946_v35 = vld [vmem:[%s4672_s2 + $0x130] ss:$8 sps:$4 sm:$0xff]  }
  0xed   :  { %1554 = vmatpush1.bf16.msra.mxu0 %v3876_v36  ;;  %1718 = vmatpush1.bf16.msra.mxu1 %v3879_v37  ;;  %v3951_v36 = vld [vmem:[%s4672_s2 + $0x144] ss:$8 sps:$4 sm:$0xff]   ;;  %v3949_v37 = vld [vmem:[%s4672_s2 + $0x140] ss:$8 sps:$4 sm:$0xff]  }
  0xee   :  { %1555 = vmatprep.subr.bf16.mxu0 %v3884_v38  ;;  %1719 = vmatprep.subr.bf16.mxu1 %v3887_v39  ;;  %v3954_v38 = vld [vmem:[%s4672_s2 + $0x154] ss:$8 sps:$4 sm:$0xff]   ;;  %v3952_v39 = vld [vmem:[%s4672_s2 + $0x150] ss:$8 sps:$4 sm:$0xff]  }
  0xf1   :  { %1556 = vmatpush1.bf16.msra.mxu0 %v3882_v40  ;;  %1720 = vmatpush1.bf16.msra.mxu1 %v3885_v41  ;;  %v3957_v40 = vld [vmem:[%s4672_s2 + $0x164] ss:$8 sps:$4 sm:$0xff]   ;;  %v3955_v41 = vld [vmem:[%s4672_s2 + $0x160] ss:$8 sps:$4 sm:$0xff]  }
  0xf2   :  { %2142 = vmatprep.subr.bf16.mxu0 %v3891_v42  ;;  %v3960_v42 = vld [vmem:[%s4672_s2 + $0x174] ss:$8 sps:$4 sm:$0xff]  }
  0xf4   :  { %1574 = vmatmul.mubr.bf16.vlgmr.msra.gmra.mrb[0].mxu0 %v3888_v43  ;;  %1738 = vmatmul.mubr.bf16.vlgmr.msra.gmra.mrb[0].mxu1 %v3888_v43  ;;  %v3958_v43 = vld [vmem:[%s4672_s2 + $0x170] ss:$8 sps:$4 sm:$0xff]  }
  0xf5   :  { %2143 = vmatpush1.bf16.msra.mxu0 %v3889_v44  ;;  %v3963_v44 = vld [vmem:[%s4672_s2 + $0x184] ss:$8 sps:$4 sm:$0xff]  }
  0xf6   :  { %2144 = vmatprep.subr.bf16.mxu0 %v3894_v45  ;;  %v3961_v45 = vld [vmem:[%s4672_s2 + $0x180] ss:$8 sps:$4 sm:$0xff]  }
  0xf9   :  { %2145 = vmatpush1.bf16.msra.mxu0 %v3892_v46  ;;  %v3966_v46 = vld [vmem:[%s4672_s2 + $0x194] ss:$8 sps:$4 sm:$0xff]  }
  0xfa   :  { %2146 = vmatprep.subr.bf16.mxu0 %v3897_v47  ;;  %v3964_v47 = vld [vmem:[%s4672_s2 + $0x190] ss:$8 sps:$4 sm:$0xff]  }
  0xfd   :  { %2147 = vmatpush1.bf16.msra.mxu0 %v3895_v48  ;;  %v3969_v48 = vld [vmem:[%s4672_s2 + $0x1a4] ss:$8 sps:$4 sm:$0xff]  }
  0xfe   :  { %2148 = vmatprep.subr.bf16.mxu0 %v3900_v49  ;;  %v3967_v49 = vld [vmem:[%s4672_s2 + $0x1a0] ss:$8 sps:$4 sm:$0xff]  }
 0x101   :  { %2149 = vmatpush1.bf16.msra.mxu0 %v3898_v50  ;;  %v3972_v50 = vld [vmem:[%s4672_s2 + $0x1b4] ss:$8 sps:$4 sm:$0xff]  }
 0x102   :  { %2150 = vmatprep.subr.bf16.mxu0 %v3903_v51  ;;  %v3970_v51 = vld [vmem:[%s4672_s2 + $0x1b0] ss:$8 sps:$4 sm:$0xff]  }
 0x105   :  { %2151 = vmatpush1.bf16.msra.mxu0 %v3901_v52  ;;  %v3975_v52 = vld [vmem:[%s4672_s2 + $0x1c4] ss:$8 sps:$4 sm:$0xff]  }
 0x106   :  { %2152 = vmatprep.subr.bf16.mxu0 %v3906_v53  ;;  %v3973_v53 = vld [vmem:[%s4672_s2 + $0x1c0] ss:$8 sps:$4 sm:$0xff]  }
 0x109   :  { %2153 = vmatpush1.bf16.msra.mxu0 %v3904_v54  ;;  %v3978_v54 = vld [vmem:[%s4672_s2 + $0x1d4] ss:$8 sps:$4 sm:$0xff]  }
 0x10a   :  { %2154 = vmatprep.subr.bf16.mxu0 %v3909_v55  ;;  %v3976_v55 = vld [vmem:[%s4672_s2 + $0x1d0] ss:$8 sps:$4 sm:$0xff]  }
 0x10d   :  { %2155 = vmatpush1.bf16.msra.mxu0 %v3907_v56  ;;  %v3981_v56 = vld [vmem:[%s4672_s2 + $0x1e4] ss:$8 sps:$4 sm:$0xff]  }
 0x10e   :  { %2156 = vmatprep.subr.bf16.mxu0 %v3912_v57  ;;  %v3979_v57 = vld [vmem:[%s4672_s2 + $0x1e0] ss:$8 sps:$4 sm:$0xff]  }
 0x111   :  { %2157 = vmatpush1.bf16.msra.mxu0 %v3910_v58 }
 0x112   :  { %2158 = vmatprep.subr.bf16.mxu0 %v3915_v59  ;;  %v3984_v59 = vld [vmem:[%s4672_s2 + $0x1f4] ss:$8 sps:$4 sm:$0xff]  }
 0x115   :  { %2159 = vmatpush1.bf16.msra.mxu0 %v3913_v60  ;;  %v3982_v60 = vld [vmem:[%s4672_s2 + $0x1f0] ss:$8 sps:$4 sm:$0xff]  }
 0x116   :  { %2160 = vmatprep.subr.bf16.mxu0 %v3918_v61 }
 0x119   :  { %2161 = vmatpush1.bf16.msra.mxu0 %v3916_v62 }
 0x11a   :  { %2162 = vmatprep.subr.bf16.mxu0 %v3921_v63  ;;  %v4039_v63 = vmov 0.0  }
 0x11b   :  { %2292 = vmatprep.mubr.f32.mxu1 %v4039_v63 }
 0x11d   :  { %2163 = vmatpush1.bf16.msra.mxu0 %v3919_v0  ;;  %v2388_v0 = vld [vmem:[%s4674_s4 + $0x80] sm:$0xff] }
 0x11e   :  { %2164 = vmatprep.subr.bf16.mxu0 %v3924_v1  ;;  %v2389_v1 = vld [vmem:[%s4674_s4 + $0x88] sm:$0xff] }
 0x121   :  { %2165 = vmatpush1.bf16.msra.mxu0 %v3922_v2 }
 0x122   :  { %2166 = vmatprep.subr.bf16.mxu0 %v3927_v3 }
 0x125   :  { %2167 = vmatpush1.bf16.msra.mxu0 %v3925_v4 }
 0x126   :  { %2168 = vmatprep.subr.bf16.mxu0 %v3930_v5 }
 0x129   :  { %2169 = vmatpush1.bf16.msra.mxu0 %v3928_v6  ;;  %v4334_v6 = vpack.c.bf16 %v2389_v1, %v2388_v0  ;;  %v2558_v0 = vld [vmem:[%s4675_s5 + $0x10] sm:$0xff]  ;;  %v2561_v1 = vld [vmem:[%s4675_s5 + $0x28] sm:$0xff] }
 0x12a   :  { %2170 = vmatprep.subr.bf16.mxu0 %v3933_v7  ;;  %v2372_v7 = vld [vmem:[%s4674_s4] sm:$0xff] }
 0x12d   :  { %2171 = vmatpush1.bf16.msra.mxu0 %v3931_v8  ;;  %v2373_v8 = vld [vmem:[%s4674_s4 + $0x8] sm:$0xff] }
 0x12e   :  { %2172 = vmatprep.subr.bf16.mxu0 %v3936_v9 }
 0x131   :  { %2173 = vmatpush1.bf16.msra.mxu0 %v3934_v10 }
 0x132   :  { %2183 = vmatprep.subr.bf16.mxu0 %v3939_v12  ;;  %v2390_v12 = vld [vmem:[%s4674_s4 + $0x90] sm:$0xff] }
 0x1c7   :  { %v1575_v13 = vpop.f32.mrb[0].mxu0  ;;  %v4223_v14 = vpop.f32.mrb[0].mxu1 }
 0x1c8   :  { %v1746_v15 = vmul.f32 0.2, %v1575_v13  ;;  %v1577_v16 = vpop.f32.mrb[1].mxu0  ;;  %v1741_v17 = vpop.f32.mrb[1].mxu1  ;;  %v1748_v58 = vmul.f32 0.2, %v4223_v14 }
 0x1c9   :  { %v1747_v18 = vmul.f32 0.2, %v1577_v16  ;;  %v1749_v19 = vmul.f32 0.2, %v1741_v17  ;;  %v1579_v20 = vpop.f32.mrb[2].mxu0  ;;  %v1743_v11 = vpop.f32.mrb[2].mxu1 }
 0x1ca   :  { %v1750_v21 = vmax.f32 %v1575_v13, %v1746_v15  ;;  %v1580_v22 = vpop.f32.mrb[3].mxu0  ;;  %v1744_v23 = vpop.f32.mrb[3].mxu1  ;;  %v1752_v61 = vmax.f32 %v4223_v14, %v1748_v58  ;;  %v2391_v13 = vld [vmem:[%s4674_s4 + $0x98] sm:$0xff]  ;;  %v4040_v14 = vmov 1.0   ;;  %v3352_v15 = vpack.c.bf16 %v2373_v8, %v2372_v7  ;;  %v2393_v20 = vld [vmem:[%s4674_s4 + $0xa8] sm:$0xff]  ;;  %v2560_v7 = vld [vmem:[%s4675_s5 + $0x20] sm:$0xff] }
 0x1cb   :  { %v1751_v24 = vmax.f32 %v1577_v16, %v1747_v18  ;;  %v1753_v25 = vmax.f32 %v1741_v17, %v1749_v19  ;;  %v3354_v16 = vpack.c.bf16 %v2391_v13, %v2390_v12  ;;  %v2374_v17 = vld [vmem:[%s4674_s4 + $0x10] sm:$0xff]  ;;  %v2375_v18 = vld [vmem:[%s4674_s4 + $0x18] sm:$0xff]  ;;  %v2392_v19 = vld [vmem:[%s4674_s4 + $0xa0] sm:$0xff] }
 0x1cc   :  { %v1754_v28 = vpack.c.bf16 %v1750_v21, %v1750_v21  ;;  %v1756_v62 = vpack.c.bf16 %v1752_v61, %v1752_v61  ;;  %v3356_v11 = vpack.c.bf16 %v2375_v18, %v2374_v17  ;;  %v3358_v21 = vpack.c.bf16 %v2393_v20, %v2392_v19  ;;  %v2376_v22 = vld [vmem:[%s4674_s4 + $0x20] sm:$0xff]  ;;  %v2377_v23 = vld [vmem:[%s4674_s4 + $0x28] sm:$0xff]  ;;  %v2562_v8 = vld [vmem:[%s4675_s5 + $0x30] sm:$0xff] }
 0x1cd   :  { %v1755_v26 = vpack.c.bf16 %v1751_v24, %v1751_v24  ;;  %v1757_v30 = vpack.c.bf16 %v1753_v25, %v1753_v25  ;;  %v2394_v24 = vld [vmem:[%s4674_s4 + $0xb0] sm:$0xff]  ;;  %v2395_v25 = vld [vmem:[%s4674_s4 + $0xb8] sm:$0xff]  ;;  %v2556_v61 = vld [vmem:[%s4675_s5] sm:$0xff] }
 0x1ce   :  { %v2567_v12 = vld [vmem:[%s4675_s5 + $0x58] sm:$0xff]  ;;  %v2569_v17 = vld [vmem:[%s4675_s5 + $0x68] sm:$0xff]  ;;  %v2568_v20 = vld [vmem:[%s4675_s5 + $0x60] sm:$0xff] }
 0x1cf   :  { %2174 = vmatprep.mubr.bf16.mxu0 %v1755_v26  ;;  %v3360_v26 = vpack.c.bf16 %v2377_v23, %v2376_v22  ;;  %v2571_v18 = vld [vmem:[%s4675_s5 + $0x78] sm:$0xff]  ;;  %v2573_v22 = vld [vmem:[%s4675_s5 + $0x88] sm:$0xff] }
 0x1d0   :  { %2175 = vmatmul.mubr.bf16.vlgmr.msra.gmra.mrb[4].mxu0 %v1754_v28  ;;  %v2378_v28 = vld [vmem:[%s4674_s4 + $0x30] sm:$0xff]  ;;  %v3426_v19 = vpack.c.bf16 %v2571_v18, %v2569_v17  ;;  %v2575_v23 = vld [vmem:[%s4675_s5 + $0x98] sm:$0xff]  ;;  %v2832_v18 = vld [vmem:[%s4673_s3 + $0x20] sm:$0xff] }
 0x1d1   :  { %2184 = vmatpush1.bf16.msra.mxu0 %v3937_v27  ;;  %2215 = vmatprep.mubr.bf16.mxu0 %v1757_v30  ;;  %v3362_v27 = vpack.c.bf16 %v2395_v25, %v2394_v24  ;;  %v2396_v30 = vld [vmem:[%s4674_s4 + $0xc0] sm:$0xff]  ;;  %v3430_v24 = vpack.c.bf16 %v2575_v23, %v2573_v22  ;;  %v2834_v23 = vld [vmem:[%s4673_s3 + $0x30] sm:$0xff] }
 0x1d2   :  { %2185 = vmatprep.subr.bf16.mxu0 %v3942_v29  ;;  %v2379_v29 = vld [vmem:[%s4674_s4 + $0x38] sm:$0xff]  ;;  %v2572_v25 = vld [vmem:[%s4675_s5 + $0x80] sm:$0xff] }
 0x1d5   :  { %2186 = vmatpush1.bf16.msra.mxu0 %v3940_v31  ;;  %v2397_v31 = vld [vmem:[%s4674_s4 + $0xc8] sm:$0xff] }
 0x1d6   :  { %2187 = vmatprep.subr.bf16.mxu0 %v3945_v32  ;;  %v3364_v32 = vpack.c.bf16 %v2379_v29, %v2378_v28  ;;  %v2577_v28 = vld [vmem:[%s4675_s5 + $0xa8] sm:$0xff]  ;;  %v2579_v29 = vld [vmem:[%s4675_s5 + $0xb8] sm:$0xff] }
 0x1d9   :  { %2188 = vmatpush1.bf16.msra.mxu0 %v3943_v33  ;;  %v3366_v33 = vpack.c.bf16 %v2397_v31, %v2396_v30  ;;  %v3434_v30 = vpack.c.bf16 %v2579_v29, %v2577_v28  ;;  %v2576_v31 = vld [vmem:[%s4675_s5 + $0xa0] sm:$0xff] }
 0x1da   :  { %2189 = vmatprep.subr.bf16.mxu0 %v3948_v34  ;;  %v2380_v34 = vld [vmem:[%s4674_s4 + $0x40] sm:$0xff] }
 0x1db   :  { %v2836_v29 = vld [vmem:[%s4673_s3 + $0x40] sm:$0xff] }
 0x1dd   :  { %2190 = vmatpush1.bf16.msra.mxu0 %v3946_v35  ;;  %v2381_v35 = vld [vmem:[%s4674_s4 + $0x48] sm:$0xff] }
 0x1de   :  { %2191 = vmatprep.subr.bf16.mxu0 %v3951_v36  ;;  %v2398_v36 = vld [vmem:[%s4674_s4 + $0xd0] sm:$0xff] }
 0x1e1   :  { %2192 = vmatpush1.bf16.msra.mxu0 %v3949_v37  ;;  %v2399_v37 = vld [vmem:[%s4674_s4 + $0xd8] sm:$0xff] }
 0x1e2   :  { %2193 = vmatprep.subr.bf16.mxu0 %v3954_v38  ;;  %v3368_v38 = vpack.c.bf16 %v2381_v35, %v2380_v34  ;;  %v2581_v34 = vld [vmem:[%s4675_s5 + $0xc8] sm:$0xff]  ;;  %v2583_v35 = vld [vmem:[%s4675_s5 + $0xd8] sm:$0xff] }
 0x1e5   :  { %2194 = vmatpush1.bf16.msra.mxu0 %v3952_v39  ;;  %v3370_v39 = vpack.c.bf16 %v2399_v37, %v2398_v36  ;;  %v2580_v36 = vld [vmem:[%s4675_s5 + $0xc0] sm:$0xff]  ;;  %v3438_v37 = vpack.c.bf16 %v2583_v35, %v2581_v34  ;;  %v2838_v35 = vld [vmem:[%s4673_s3 + $0x50] sm:$0xff] }
 0x1e6   :  { %2195 = vmatprep.subr.bf16.mxu0 %v3957_v40  ;;  %v2382_v40 = vld [vmem:[%s4674_s4 + $0x50] sm:$0xff] }
 0x1e9   :  { %2196 = vmatpush1.bf16.msra.mxu0 %v3955_v41  ;;  %v2383_v41 = vld [vmem:[%s4674_s4 + $0x58] sm:$0xff] }
 0x1ea   :  { %2197 = vmatprep.subr.bf16.mxu0 %v3960_v42  ;;  %v2400_v42 = vld [vmem:[%s4674_s4 + $0xe0] sm:$0xff] }
 0x1ed   :  { %2198 = vmatpush1.bf16.msra.mxu0 %v3958_v43  ;;  %v2401_v43 = vld [vmem:[%s4674_s4 + $0xe8] sm:$0xff] }
 0x1ee   :  { %2199 = vmatprep.subr.bf16.mxu0 %v3963_v44  ;;  %v3372_v44 = vpack.c.bf16 %v2383_v41, %v2382_v40  ;;  %v2587_v40 = vld [vmem:[%s4675_s5 + $0xf8] sm:$0xff] }
 0x1f1   :  { %2200 = vmatpush1.bf16.msra.mxu0 %v3961_v45  ;;  %v3374_v45 = vpack.c.bf16 %v2401_v43, %v2400_v42  ;;  %v2584_v43 = vld [vmem:[%s4675_s5 + $0xe0] sm:$0xff] }
 0x1f2   :  { %2201 = vmatprep.subr.bf16.mxu0 %v3966_v46  ;;  %v2384_v46 = vld [vmem:[%s4674_s4 + $0x60] sm:$0xff] }
 0x1f5   :  { %2202 = vmatpush1.bf16.msra.mxu0 %v3964_v47  ;;  %v2385_v47 = vld [vmem:[%s4674_s4 + $0x68] sm:$0xff] }
 0x1f6   :  { %2203 = vmatprep.subr.bf16.mxu0 %v3969_v48  ;;  %v2402_v48 = vld [vmem:[%s4674_s4 + $0xf0] sm:$0xff] }
 0x1f9   :  { %2204 = vmatpush1.bf16.msra.mxu0 %v3967_v49  ;;  %v2403_v49 = vld [vmem:[%s4674_s4 + $0xf8] sm:$0xff] }
 0x1fa   :  { %2205 = vmatprep.subr.bf16.mxu0 %v3972_v50  ;;  %v3376_v50 = vpack.c.bf16 %v2385_v47, %v2384_v46 }
 0x1fd   :  { %2206 = vmatpush1.bf16.msra.mxu0 %v3970_v51  ;;  %v3378_v51 = vpack.c.bf16 %v2403_v49, %v2402_v48 }
 0x1fe   :  { %2207 = vmatprep.subr.bf16.mxu0 %v3975_v52  ;;  %v2386_v52 = vld [vmem:[%s4674_s4 + $0x70] sm:$0xff] }
 0x201   :  { %2208 = vmatpush1.bf16.msra.mxu0 %v3973_v53  ;;  %v2387_v53 = vld [vmem:[%s4674_s4 + $0x78] sm:$0xff] }
 0x202   :  { %2209 = vmatprep.subr.bf16.mxu0 %v3978_v54  ;;  %v3380_v54 = vpack.c.bf16 %v2387_v53, %v2386_v52 }
 0x205   :  { %2210 = vmatpush1.bf16.msra.mxu0 %v3976_v55 }
 0x206   :  { %2211 = vmatprep.subr.bf16.mxu0 %v3981_v56 }
 0x209   :  { %2212 = vmatpush1.bf16.msra.mxu0 %v3979_v57 }
 0x20a   :  { %2213 = vmatprep.subr.bf16.mxu0 %v3984_v59  ;;  %v2557_v59 = vld [vmem:[%s4675_s5 + $0x8] sm:$0xff] }
 0x20d   :  { %2214 = vmatpush1.bf16.msra.mxu0 %v3982_v60  ;;  %v2559_v60 = vld [vmem:[%s4675_s5 + $0x18] sm:$0xff] }
 0x210   :  { %2216 = vmatmul.mubr.bf16.vlgmr.msra.gmra.mrb[4].mxu0 %v1756_v62  ;;  %v3414_v62 = vpack.c.bf16 %v2559_v60, %v2557_v59 }
 0x2e3   :  { %v4327_v2 = vpop.f32.mrb[4].mxu0 }
 0x2e4   :  { %v4329_v3 = vpop.f32.mrb[5].mxu0  ;;  %v2299_v9 = vmul.f32 %v4327_v2, %v4327_v2 }
 0x2e5   :  { %v2300_v4 = vmul.f32 %v4329_v3, %v4329_v3  ;;  %v2221_v5 = vpop.f32.mrb[6].mxu0  ;;  %2228 = vmatprep.subr.mxu1 %v4329_v3 }
 0x2e6   :  { %v2222_v10 = vpop.f32.mrb[7].mxu0  ;;  %2229 = vmatpush1.msra.mxu1 %v4327_v2  ;;  %v4453_v5 = vpack.c.bf16 %v2558_v0, %v2556_v61 }
 0x2e7   :  { %3242 = vmatmul.mubr.msk.f32.vlgmr.msra.gmra.mrb[4].mxu1 %vm2224_vm0, %v4040_v14  ;;  %2301 = vmatprep.subr.mxu1 %v2300_v4  ;;  %v2563_v4 = vld [vmem:[%s4675_s5 + $0x38] sm:$0xff]  ;;  %v2565_v10 = vld [vmem:[%s4675_s5 + $0x48] sm:$0xff] }
 0x2e8   :  { %2302 = vmatpush1.msra.mxu1 %v2299_v9  ;;  %2365 = vmatprep.mubr.f32.mxu1 %v4039_v63  ;;  %v4464_v9 = vpack.c.bf16 %v2562_v8, %v2560_v7  ;;  %v4474_v13 = vpack.c.bf16 %v2567_v12, %v2565_v10  ;;  %v2829_v7 = vld [vmem:[%s4673_s3 + $0x8] sm:$0xff]  ;;  %v2847_v8 = vld [vmem:[%s4673_s3 + $0x98] sm:$0xff]  ;;  %v2830_v12 = vld [vmem:[%s4673_s3 + $0x10] sm:$0xff] }
 0x2e9   :  { %3351 = vmatprep.subr.bf16.mxu1 %v4334_v6 }
 0x2eb   :  { %3243 = vmatmul.mubr.msk.f32.vlgmr.msra.gmra.mrb[6].mxu1 %vm2224_vm0, %v4040_v14  ;;  %v2564_v14 = vld [vmem:[%s4675_s5 + $0x40] sm:$0xff] }
 0x2ec   :  { %3353 = vmatpush3.bf16.msra.mxu1 %v3352_v15 }
 0x2ed   :  { %3355 = vmatprep.subr.bf16.mxu1 %v3354_v16 }
 0x2f0   :  { %3357 = vmatpush3.bf16.msra.mxu1 %v3356_v11 }
 0x2f1   :  { %3359 = vmatprep.subr.bf16.mxu1 %v3358_v21 }
 0x2f4   :  { %3361 = vmatpush3.bf16.msra.mxu1 %v3360_v26 }
 0x2f5   :  { %3363 = vmatprep.subr.bf16.mxu1 %v3362_v27 }
 0x2f8   :  { %3365 = vmatpush3.bf16.msra.mxu1 %v3364_v32 }
 0x2f9   :  { %3367 = vmatprep.subr.bf16.mxu1 %v3366_v33 }
 0x2fc   :  { %3369 = vmatpush3.bf16.msra.mxu1 %v3368_v38 }
 0x2fd   :  { %3371 = vmatprep.subr.bf16.mxu1 %v3370_v39 }
 0x300   :  { %3373 = vmatpush3.bf16.msra.mxu1 %v3372_v44 }
 0x301   :  { %3375 = vmatprep.subr.bf16.mxu1 %v3374_v45 }
 0x304   :  { %3377 = vmatpush3.bf16.msra.mxu1 %v3376_v50 }
 0x305   :  { %3379 = vmatprep.subr.bf16.mxu1 %v3378_v51 }
 0x308   :  { %3381 = vmatpush3.bf16.msra.mxu1 %v3380_v54 }
 0x309   :  { %3383 = vmatprep.subr.bf16.mxu1 %v4334_v6  ;;  %v4455_v6 = vpack.c.bf16 %v2563_v4, %v2561_v1  ;;  %v2844_v1 = vld [vmem:[%s4673_s3 + $0x80] sm:$0xff]  ;;  %v2845_v4 = vld [vmem:[%s4673_s3 + $0x88] sm:$0xff] }
 0x3ba   :  { %v2294_v55 = vpop.f32.mrb[4].mxu1 }
 0x3bb   :  { %v2296_v56 = vpop.f32.mrb[5].mxu1 }
 0x3bc   :  { %2468 = vmatprep.mubr.f32.mxu1 %v2296_v56 }
 0x3bd   :  { %2469 = vmatmul.mubr.f32.vlgmr.msra.gmra.mrb[8].mxu1 %v2294_v55 }
 0x3be   :  { %3385 = vmatpush3.bf16.msra.mxu1 %v3352_v15  ;;  %v2367_v57 = vpop.f32.mrb[6].mxu1  ;;  %v2566_v15 = vld [vmem:[%s4675_s5 + $0x50] sm:$0xff] }
 0x3bf   :  { %3387 = vmatprep.subr.bf16.mxu1 %v3354_v16  ;;  %v2369_v58 = vpop.f32.mrb[7].mxu1  ;;  %v4482_v16 = vpack.c.bf16 %v2566_v15, %v2564_v14  ;;  %v2848_v14 = vld [vmem:[%s4673_s3 + $0xa0] sm:$0xff]  ;;  %v2849_v15 = vld [vmem:[%s4673_s3 + $0xa8] sm:$0xff] }
 0x3c0   :  { %2539 = vmatprep.mubr.f32.mxu1 %v2369_v58  ;;  %v2551_v58 = vld [vmem:[%s4676_s6] sm:$0x1]  ;;  %v3486_v17 = vpack.c.bf16 %v2849_v15, %v2848_v14 }
 0x3c2   :  { %3389 = vmatpush3.bf16.msra.mxu1 %v3356_v11  ;;  %v2570_v11 = vld [vmem:[%s4675_s5 + $0x70] sm:$0xff] }
 0x3c3   :  { %3391 = vmatprep.subr.bf16.mxu1 %v3358_v21  ;;  %v3428_v21 = vpack.c.bf16 %v2570_v11, %v2568_v20  ;;  %v2850_v20 = vld [vmem:[%s4673_s3 + $0xb0] sm:$0xff]  ;;  %v2851_v11 = vld [vmem:[%s4673_s3 + $0xb8] sm:$0xff] }
 0x3c4   :  { %v3490_v22 = vpack.c.bf16 %v2851_v11, %v2850_v20 }
 0x3c6   :  { %3393 = vmatpush3.bf16.msra.mxu1 %v3360_v26  ;;  %v2574_v26 = vld [vmem:[%s4675_s5 + $0x90] sm:$0xff] }
 0x3c7   :  { %3395 = vmatprep.subr.bf16.mxu1 %v3362_v27  ;;  %v3432_v27 = vpack.c.bf16 %v2574_v26, %v2572_v25  ;;  %v2852_v25 = vld [vmem:[%s4673_s3 + $0xc0] sm:$0xff]  ;;  %v2853_v26 = vld [vmem:[%s4673_s3 + $0xc8] sm:$0xff] }
 0x3c8   :  { %v3494_v28 = vpack.c.bf16 %v2853_v26, %v2852_v25 }
 0x3ca   :  { %3397 = vmatpush3.bf16.msra.mxu1 %v3364_v32  ;;  %v2578_v32 = vld [vmem:[%s4675_s5 + $0xb0] sm:$0xff] }
 0x3cb   :  { %3399 = vmatprep.subr.bf16.mxu1 %v3366_v33  ;;  %v3436_v33 = vpack.c.bf16 %v2578_v32, %v2576_v31  ;;  %v2854_v31 = vld [vmem:[%s4673_s3 + $0xd0] sm:$0xff]  ;;  %v2855_v32 = vld [vmem:[%s4673_s3 + $0xd8] sm:$0xff] }
 0x3cc   :  { %v3498_v34 = vpack.c.bf16 %v2855_v32, %v2854_v31 }
 0x3ce   :  { %3401 = vmatpush3.bf16.msra.mxu1 %v3368_v38  ;;  %v2582_v38 = vld [vmem:[%s4675_s5 + $0xd0] sm:$0xff] }
 0x3cf   :  { %3403 = vmatprep.subr.bf16.mxu1 %v3370_v39  ;;  %v2585_v39 = vld [vmem:[%s4675_s5 + $0xe8] sm:$0xff]  ;;  %v3440_v41 = vpack.c.bf16 %v2582_v38, %v2580_v36  ;;  %v2839_v36 = vld [vmem:[%s4673_s3 + $0x58] sm:$0xff] }
 0x3d0   :  { %v3442_v42 = vpack.c.bf16 %v2587_v40, %v2585_v39  ;;  %v2857_v38 = vld [vmem:[%s4673_s3 + $0xe8] sm:$0xff]  ;;  %v3500_v39 = vpack.c.bf16 %v2839_v36, %v2838_v35 }
 0x3d2   :  { %3405 = vmatpush3.bf16.msra.mxu1 %v3372_v44  ;;  %v2586_v44 = vld [vmem:[%s4675_s5 + $0xf0] sm:$0xff] }
 0x3d3   :  { %3407 = vmatprep.subr.bf16.mxu1 %v3374_v45  ;;  %v3444_v45 = vpack.c.bf16 %v2586_v44, %v2584_v43  ;;  %v2858_v43 = vld [vmem:[%s4673_s3 + $0xf0] sm:$0xff]  ;;  %v2859_v44 = vld [vmem:[%s4673_s3 + $0xf8] sm:$0xff] }
 0x3d6   :  { %3409 = vmatpush3.bf16.msra.mxu1 %v3376_v50 }
 0x3d7   :  { %3411 = vmatprep.subr.bf16.mxu1 %v3378_v51 }
 0x3da   :  { %3413 = vmatpush3.bf16.msra.mxu1 %v3380_v54 }
 0x3db   :  { %3415 = vmatprep.subr.bf16.mxu1 %v3414_v62 }
 0x3dd   :  { %2540 = vmatmul.mubr.f32.vlgmr.msra.gmra.mrb[10].mxu1 %v2367_v57 }
 0x3de   :  { %2652 = vmatprep.mubr.f32.mxu1 %v4039_v63  ;;  %3417 = vmatpush1.bf16.msra.mxu1 %v4453_v5 }
 0x3df   :  { %3419 = vmatprep.subr.bf16.mxu1 %v4455_v6 }
 0x3e2   :  { %3421 = vmatpush1.bf16.msra.mxu1 %v4464_v9 }
 0x3e3   :  { %3423 = vmatprep.subr.bf16.mxu1 %v4474_v13 }
 0x3e6   :  { %3425 = vmatpush1.bf16.msra.mxu1 %v4482_v16 }
 0x3e7   :  { %3427 = vmatprep.subr.bf16.mxu1 %v3426_v19 }
 0x3ea   :  { %3429 = vmatpush1.bf16.msra.mxu1 %v3428_v21 }
 0x3eb   :  { %3431 = vmatprep.subr.bf16.mxu1 %v3430_v24 }
 0x3ee   :  { %3433 = vmatpush1.bf16.msra.mxu1 %v3432_v27 }
 0x3ef   :  { %3435 = vmatprep.subr.bf16.mxu1 %v3434_v30 }
 0x3f2   :  { %3437 = vmatpush1.bf16.msra.mxu1 %v3436_v33 }
 0x3f3   :  { %3439 = vmatprep.subr.bf16.mxu1 %v3438_v37 }
 0x3f6   :  { %3441 = vmatpush1.bf16.msra.mxu1 %v3440_v41 }
 0x3f7   :  { %3443 = vmatprep.subr.bf16.mxu1 %v3442_v42 }
 0x3fa   :  { %3445 = vmatpush1.bf16.msra.mxu1 %v3444_v45 }
 0x3fb   :  { %3447 = vmatprep.subr.bf16.mxu1 %v3414_v62  ;;  %v2553_v62 = vld [vmem:[%s4677_s7] sm:$0x1]  ;;  %s2938_s7 = sshll.u32 %s4042_s18, 4  ;;  %s2939_s7 = int_to_ptr.vmem [resolvable:$true] %s2938_s7 }
 0x3fc   :  { %s4009_s1 = scalar_lea.vmem %s2939_s7, 16  ;;  %s4013_s19 = scalar_lea.vmem %s2939_s7, 32 }
 0x3fd   :  { %p4010_p8 = scmp.ne.s32.totalorder %s2939_s7, %s4009_s1  ;;  %p4014_p9 = scmp.lt.s32.totalorder %s2939_s7, %s2939_s7 }
 0x3fe   :  { %p4015_p10 = scmp.lt.s32.totalorder %s4013_s19, %s4009_s1 }
 0x400   :  { %p4016_p11 = por %p4015_p10, %p4014_p9 }
 0x402   :  { %p4017_p12 = pnand %p4016_p11, %p4010_p8 }
 0x490   :  { %v3277_v46 = vpop.f32.mrb[8].mxu1 }
 0x491   :  { %v3278_v47 = vpop.f32.mrb[9].mxu1 }
 0x492   :  { %v3279_v48 = vadd.f32 %v3278_v47, %v3277_v46  ;;  %v3506_v46 = vpack.c.bf16 %v2859_v44, %v2858_v43  ;;  %v2730_v47 = vlaneseq }
 0x494   :  { %v2474_v49 = vmul.f32 0.125, %v3279_v48  ;;  %v2731_v48 = vshrl.u32 %v2730_v47, 7 }
 0x496   :  { %v2546_v53 = vmul.f32 %v2474_v49, %v2474_v49 }
 0x4b0   :  { %v3312_v50 = vpop.f32.mrb[10].mxu1 }
 0x4b1   :  { %v3313_v51 = vpop.f32.mrb[11].mxu1 }
 0x4b2   :  { %v3314_v52 = vadd.f32 %v3313_v51, %v3312_v50 }
 0x4b4   :  { %v2545_v54 = vmul.f32 0.125, %v3314_v52 }
 0x4b6   :  { %v2547_v55 = vsub.f32 %v2545_v54, %v2546_v53 }
 0x4b8   :  { %v2548_v56 = vmax.f32 %v2547_v55, 0.0 }
 0x4ba   :  { %v2549_v57 = vadd.f32 1e-05, %v2548_v56 }
 0x4bc   :  { %3985 = vrsqrt.f32 %v2549_v57 }
 0x4c6   :  { %v3986_v59 = vpop.eup %3985 }
 0x4c7   :  { %v2552_v60 = vmul.f32 %v3986_v59, %v2551_v58 }
 0x4c9   :  { %2653 = vmatmul.mubr.f32.vlgmr.msra.gmra.mrb[12].mxu1 %v2552_v60  ;;  %v2554_v61 = vmul.f32 %v2552_v60, %v2474_v49  ;;  %v2732_v49 = vsub.s32 0, %v2731_v48 }
 0x4ca   :  { %3449 = vmatpush1.bf16.msra.mxu1 %v4453_v5  ;;  %2723 = vmatprep.mubr.f32.mxu1 %v4039_v63  ;;  %v2828_v5 = vld [vmem:[%s4673_s3] sm:$0xff] }
 0x4cb   :  { %3451 = vmatprep.subr.bf16.mxu1 %v4455_v6  ;;  %v2555_v0 = vsub.f32 %v2553_v62, %v2554_v61  ;;  %v3478_v6 = vpack.c.bf16 %v2845_v4, %v2844_v1 }
 0x4cd   :  { %3479 = vmatprep.subr.bf16.mxu0 %v3478_v6 }
 0x4ce   :  { %3453 = vmatpush1.bf16.msra.mxu1 %v4464_v9  ;;  %v3480_v9 = vpack.c.bf16 %v2829_v7, %v2828_v5  ;;  %v4041_v5 = vmov 0.125  }
 0x4cf   :  { %3455 = vmatprep.subr.bf16.mxu1 %v4474_v13  ;;  %v2831_v13 = vld [vmem:[%s4673_s3 + $0x18] sm:$0xff] }
 0x4d0   :  { %3481 = vmatpush3.bf16.msra.mxu0 %v3480_v9 }
 0x4d2   :  { %3457 = vmatpush1.bf16.msra.mxu1 %v4482_v16  ;;  %v3484_v16 = vpack.c.bf16 %v2831_v13, %v2830_v12 }
 0x4d3   :  { %3459 = vmatprep.subr.bf16.mxu1 %v3426_v19  ;;  %v2833_v19 = vld [vmem:[%s4673_s3 + $0x28] sm:$0xff] }
 0x4d6   :  { %3461 = vmatpush1.bf16.msra.mxu1 %v3428_v21  ;;  %v3488_v21 = vpack.c.bf16 %v2833_v19, %v2832_v18 }
 0x4d7   :  { %3463 = vmatprep.subr.bf16.mxu1 %v3430_v24  ;;  %v2835_v24 = vld [vmem:[%s4673_s3 + $0x38] sm:$0xff] }
 0x4da   :  { %3465 = vmatpush1.bf16.msra.mxu1 %v3432_v27  ;;  %v3492_v27 = vpack.c.bf16 %v2835_v24, %v2834_v23 }
 0x4db   :  { %3467 = vmatprep.subr.bf16.mxu1 %v3434_v30  ;;  %v2837_v30 = vld [vmem:[%s4673_s3 + $0x48] sm:$0xff] }
 0x4de   :  { %3469 = vmatpush1.bf16.msra.mxu1 %v3436_v33  ;;  %v3496_v33 = vpack.c.bf16 %v2837_v30, %v2836_v29 }
 0x4df   :  { %3471 = vmatprep.subr.bf16.mxu1 %v3438_v37  ;;  %v2856_v37 = vld [vmem:[%s4673_s3 + $0xe0] sm:$0xff] }
 0x4e0   :  { %v3502_v40 = vpack.c.bf16 %v2857_v38, %v2856_v37 }
 0x4e2   :  { %3473 = vmatpush1.bf16.msra.mxu1 %v3440_v41  ;;  %v2840_v41 = vld [vmem:[%s4673_s3 + $0x60] sm:$0xff] }
 0x4e3   :  { %3475 = vmatprep.subr.bf16.mxu1 %v3442_v42  ;;  %v2841_v42 = vld [vmem:[%s4673_s3 + $0x68] sm:$0xff] }
 0x4e6   :  { %3477 = vmatpush1.bf16.msra.mxu1 %v3444_v45  ;;  %v3504_v45 = vpack.c.bf16 %v2841_v42, %v2840_v41 }
 0x4e9   :  { %2724 = vmatmul.mubr.f32.vlgmr.msra.gmra.mrb[14].mxu1 %v2555_v0 }
 0x4ea   :  { %2821 = vmatprep.mubr.f32.mxu1 %v4039_v63  ;;  %v2846_v63 = vld [vmem:[%s4673_s3 + $0x90] sm:$0xff] }
 0x4eb   :  { %v3482_v10 = vpack.c.bf16 %v2847_v8, %v2846_v63 }
 0x4ed   :  { %3483 = vmatprep.subr.bf16.mxu0 %v3482_v10 }
 0x4ee   :  { %3485 = vmatpush3.bf16.msra.mxu0 %v3484_v16 }
 0x4ef   :  { %3487 = vmatprep.subr.bf16.mxu0 %v3486_v17 }
 0x4f2   :  { %3489 = vmatpush3.bf16.msra.mxu0 %v3488_v21 }
 0x4f3   :  { %3491 = vmatprep.subr.bf16.mxu0 %v3490_v22 }
 0x4f6   :  { %3493 = vmatpush3.bf16.msra.mxu0 %v3492_v27 }
 0x4f7   :  { %3495 = vmatprep.subr.bf16.mxu0 %v3494_v28 }
 0x4fa   :  { %3497 = vmatpush3.bf16.msra.mxu0 %v3496_v33 }
 0x4fb   :  { %3499 = vmatprep.subr.bf16.mxu0 %v3498_v34 }
 0x4fe   :  { %3501 = vmatpush3.bf16.msra.mxu0 %v3500_v39 }
 0x4ff   :  { %3503 = vmatprep.subr.bf16.mxu0 %v3502_v40 }
 0x502   :  { %3505 = vmatpush3.bf16.msra.mxu0 %v3504_v45 }
 0x503   :  { %3507 = vmatprep.subr.bf16.mxu0 %v3506_v46 }
 0x59c   :  { %v2654_v50 = vpop.f32.mrb[12].mxu1 }
 0x59d   :  { %v2733_v51 = vrot.slane %v2654_v50, %v2732_v49  ;;  %v2656_v52 = vpop.f32.mrb[13].mxu1 }
 0x59e   :  { %v2737_v53 = vrot.slane %v2656_v52, %v2732_v49 }
 0x59f   :  { %v2738_v54 = vmul.f32 %v2733_v51, %v4327_v2  ;;  %v2842_v2 = vld [vmem:[%s4673_s3 + $0x70] sm:$0xff] }
 0x5a0   :  { %v2739_v55 = vmul.f32 %v2737_v53, %v4329_v3  ;;  %v2843_v3 = vld [vmem:[%s4673_s3 + $0x78] sm:$0xff] }
 0x5a1   :  { %v3508_v6 = vpack.c.bf16 %v2843_v3, %v2842_v2 }
 0x5a3   :  { %3509 = vmatpush3.bf16.msra.mxu0 %v3508_v6 }
 0x5bc   :  { %v2725_v56 = vpop.f32.mrb[14].mxu1 }
 0x5bd   :  { %v2743_v57 = vrot.slane %v2725_v56, %v2732_v49  ;;  %v2727_v58 = vpop.f32.mrb[15].mxu1 }
 0x5be   :  { %v2747_v59 = vrot.slane %v2727_v58, %v2732_v49 }
 0x5bf   :  { %v2748_v60 = vadd.f32 %v2743_v57, %v2738_v54 }
 0x5c0   :  { %v2749_v61 = vadd.f32 %v2747_v59, %v2739_v55 }
 0x5c1   :  { %v2750_v62 = vmul.f32 0.2, %v2748_v60 }
 0x5c2   :  { %v2751_v0 = vmul.f32 0.2, %v2749_v61 }
 0x5c3   :  { %v2752_v4 = vmax.f32 %v2748_v60, %v2750_v62 }
 0x5c4   :  { %v2753_v1 = vmax.f32 %v2749_v61, %v2751_v0 }
 0x5c6   :  { %2757 = vmatprep.subr.mxu1 %v2753_v1 }
 0x5c7   :  { %2758 = vmatpush1.msra.mxu1 %v2752_v4 }
 0x5c8   :  { %3244 = vmatmul.mubr.msk.f32.vlgmr.msra.gmra.mrb[16].mxu1 %vm2224_vm0, %v4041_v5 }
 0x69b   :  { %v2823_v7 = vpop.f32.mrb[16].mxu1 }
 0x69c   :  { %v2825_v63 = vpop.f32.mrb[17].mxu1 }
 0x69d   :  { %2924 = vmatprep.mubr.f32.mxu0 %v2825_v63 }
 0x69e   :  { %2925 = vmatmul.mubr.f32.vlgmr.msra.gmra.mrb[8].mxu0 %v2823_v7 }
 0x771   :  { %v3347_v8 = vpop.f32.mrb[8].mxu0 }
 0x772   :  { %v3348_v9 = vpop.f32.mrb[9].mxu0 }
 0x773   :  { %v3349_v10 = vadd.f32 %v3348_v9, %v3347_v8 }
 0x775   :  { %2931 = vst.msk [vmem:[#allocation5] sm:$0x1] %vm2930_vm1, %v3349_v10 }
 0x776   :  { %4020 = shalt.err (!%p4017_p12)
}
 0x777   :  { %s4021_s21 = scalar_lea.hbm %s4678_s8, 16 }
 0x778   :  { %p4022_p13 = scmp.ne.s32.totalorder %s4678_s8, %s4021_s21  ;;  %p4025_p0 = scmp.lt.u32.totalorder %s4021_s21, %s4678_s8 }
 0x77a   :  { %p4027_p1 = pnand %p4025_p0, %p4022_p13 }
 0x77c   :  { %4030 = shalt.err (!%p4027_p1)
}
 0x77d   :  { %2941 = dma.vmem_to_hbm [thread:$0]  %s2939_s7, 16, %s4678_s8, [#allocation4]  }
 0x77e   :  { %4033 = dma.done.wait [#allocation4], 16  }
 0x77f   :  { %4034 = vsyncadd [#allocation4], 4294967280 }
 0x780   :  { %2945 = vsyncpa [#allocation3], 1 }
 0x781   :  { %2946 = vsyncpa [#allocation4], 1 }

</bundles_post_ra>
